<compile_context>
chip_gen: v7x
topology: tpu7x:2x2x1
jax: 0.10.0
libtpu: 0.0.40
codegen_flags: <defaults>
</compile_context>

<pallas_src>
import functools
import math

import jax
import jax.numpy as jnp
from jax.experimental import pallas as pl
from jax.experimental.pallas import tpu as pltpu


def mhsa_kernel(x_ref, wqkv_ref, bqkv_ref, wo_ref, bo_ref, o_ref, *,
                heads, head_dim, bt, seq, compute_dtype):
    """One batch-tile (Bt folded batch elements) per grid step.

    x_ref:    (Bt*N, D)   input rows (batch folded into M)
    wqkv_ref: (D, 3D)     fused [Wq^T | Wk^T | Wv^T], compute_dtype (bf16)
    bqkv_ref: (1, 3D)     fused bias, f32
    wo_ref:   (D, D)      Wo^T, compute_dtype (bf16)
    bo_ref:   (1, D)      output bias, f32
    o_ref:    (Bt*N, D)   output rows
    """
    D = heads * head_dim
    m = bt * seq

    x = x_ref[...].astype(compute_dtype)                         # (M, D) bf16

    # Fused Q/K/V projection: one big MXU matmul, f32 accumulation, one bias add.
    qkv = jnp.dot(x, wqkv_ref[...], preferred_element_type=jnp.float32)
    qkv = qkv + bqkv_ref[...]                                    # (M, 3D) f32
    qkv = qkv.reshape(bt, seq, 3 * D)                            # un-fold batch

    wo = wo_ref[...]                                             # (D, D) bf16
    scale = 1.0 / math.sqrt(head_dim)

    out_acc = jnp.zeros((m, D), jnp.float32)
    for h in range(heads):
        q_sl = slice(h * head_dim, (h + 1) * head_dim)
        k_sl = slice(D + h * head_dim, D + (h + 1) * head_dim)
        v_sl = slice(2 * D + h * head_dim, 2 * D + (h + 1) * head_dim)

        # Per-head operands, bf16 for the MXU; scale folded into q (f32, once).
        qh = (qkv[:, :, q_sl] * scale).astype(compute_dtype)     # (Bt, N, hd)
        kh = qkv[:, :, k_sl].astype(compute_dtype)               # (Bt, N, hd)
        vh = qkv[:, :, v_sl].astype(compute_dtype)               # (Bt, N, hd)

        # q @ k^T batched over the folded batch dim -- no explicit transpose.
        s = jnp.einsum("bqd,bkd->bqk", qh, kh,
                       preferred_element_type=jnp.float32)       # (Bt, N, N) f32

        # Max-stabilised softmax in f32; reciprocal on the EUP.
        s = s - jnp.max(s, axis=-1, keepdims=True)
        p = jnp.exp(s)
        p = p * pl.reciprocal(jnp.sum(p, axis=-1, keepdims=True), approx=True)

        ah = jnp.einsum("bqk,bkd->bqd", p.astype(compute_dtype), vh,
                        preferred_element_type=jnp.float32)      # (Bt, N, hd) f32

        # Fold the output projection per head (replaces concat + one big matmul):
        #   out += A_h @ Wo^T[h*hd:(h+1)*hd, :]
        out_acc = out_acc + jnp.dot(
            ah.reshape(m, head_dim).astype(compute_dtype),
            wo[q_sl, :],
            preferred_element_type=jnp.float32)

    out = out_acc + bo_ref[...]                                  # (M, D) f32
    o_ref[...] = out.astype(o_ref.dtype)


def _batch_fold(batch, seq, target_rows=256):
    """Fold enough batch elements into one grid step to reach ~target_rows rows."""
    bt = max(1, min(batch, target_rows // max(seq, 1)))
    while bt > 1 and batch % bt:
        bt -= 1
    return bt


def multihead_self_attention(x, params, heads, compute_dtype=jnp.bfloat16):
    """x: (B, N, D) float32.  params: dict of (W^T, b) per projection (f32)."""
    B, N, D = x.shape
    head_dim = D // heads
    assert head_dim * heads == D, "dim must be divisible by heads"

    wq, bq = params["q"]
    wk, bk = params["k"]
    wv, bv = params["v"]
    wo, bo = params["o"]

    # Fused QKV weight/bias; weights in compute_dtype (bf16) -> half the HBM
    # traffic / VMEM residency; biases stay f32.
    wqkv = jnp.concatenate([wq, wk, wv], axis=1).astype(compute_dtype)  # (D, 3D)
    bqkv = jnp.concatenate([bq, bk, bv], axis=1).astype(jnp.float32)    # (1, 3D)
    wo_c = wo.astype(compute_dtype)                                     # (D, D)
    bo_c = bo.astype(jnp.float32)                                       # (1, D)

    # Fold batch elements into the matmul M dimension (N is small).
    bt = _batch_fold(B, N)
    m = bt * N
    rows = B * N
    x2 = x.reshape(rows, D)

    kernel = functools.partial(
        mhsa_kernel, heads=heads, head_dim=head_dim, bt=bt, seq=N,
        compute_dtype=compute_dtype)

    row_spec = pl.BlockSpec((m, D), lambda i: (i, 0))
    wqkv_spec = pl.BlockSpec((D, 3 * D), lambda i: (0, 0))
    bqkv_spec = pl.BlockSpec((1, 3 * D), lambda i: (0, 0))
    wo_spec = pl.BlockSpec((D, D), lambda i: (0, 0))
    bo_spec = pl.BlockSpec((1, D), lambda i: (0, 0))

    out2 = pl.pallas_call(
        kernel,
        out_shape=jax.ShapeDtypeStruct((rows, D), x.dtype),
        grid_spec=pltpu.PrefetchScalarGridSpec(
            num_scalar_prefetch=0,
            grid=(B // bt,),
            in_specs=[row_spec, wqkv_spec, bqkv_spec, wo_spec, bo_spec],
            out_specs=row_spec,
        ),
        compiler_params=pltpu.CompilerParams(
            dimension_semantics=("parallel",),
            vmem_limit_bytes=32 * 1024 * 1024),
    )(x2, wqkv, bqkv, wo_c, bo_c)

    return out2.reshape(B, N, D)


def reference_mhsa(x, params, heads):
    """Pure-JAX f32 reference mirroring the PyTorch forward (eval mode, mask=None)."""
    B, N, D = x.shape
    hd = D // heads
    wq, bq = params["q"]
    wk, bk = params["k"]
    wv, bv = params["v"]
    wo, bo = params["o"]
    q = (x @ wq + bq).reshape(B, N, heads, hd).transpose(0, 2, 1, 3)
    k = (x @ wk + bk).reshape(B, N, heads, hd).transpose(0, 2, 1, 3)
    v = (x @ wv + bv).reshape(B, N, heads, hd).transpose(0, 2, 1, 3)
    s = jnp.einsum("bhqd,bhkd->bhqk", q, k) / math.sqrt(hd)
    p = jax.nn.softmax(s, axis=-1)
    a = jnp.einsum("bhqk,bhkd->bhqd", p, v)
    a = a.transpose(0, 2, 1, 3).reshape(B, N, D)
    return a @ wo + bo


def init_params(key, dim):
    """Deterministic synthetic parameters. Weights stored pre-transposed (W^T)."""
    ks = jax.random.split(key, 8)

    def lin(kw, kb):
        w_t = jax.random.normal(kw, (dim, dim), jnp.float32) * 0.05  # W^T
        b = jax.random.normal(kb, (1, dim), jnp.float32) * 0.05
        return w_t, b

    return {
        "q": lin(ks[0], ks[1]),
        "k": lin(ks[2], ks[3]),
        "v": lin(ks[4], ks[5]),
        "o": lin(ks[6], ks[7]),
    }


if __name__ == "__main__":
    B, N, D, H = 2, 8, 32, 8
    key = jax.random.PRNGKey(0)
    kx, kp = jax.random.split(key)
    x = jax.random.normal(kx, (B, N, D), jnp.float32)
    params = init_params(kp, D)

    out = multihead_self_attention(x, params, heads=H)
    out = jax.block_until_ready(out)

    ref = reference_mhsa(x, params, heads=H)
    assert out.shape == (B, N, D)
    max_err = jnp.max(jnp.abs(out - ref))
    # bf16 MXU operands vs. an f32 reference -> loose tolerance; structural bugs
    # would produce errors orders of magnitude larger than this.
    assert jnp.allclose(out, ref, atol=2e-2, rtol=2e-2), f"max abs err {max_err}"

    print("KERNEL_OK")
</pallas_src>

<mosaic_0001>
module attributes {stable_mosaic.version = 11 : i64} {
  func.func @mhsa_kernel(%arg0: i32, %arg1: memref<16x32xf32, #tpu.memory_space<vmem>>, %arg2: memref<32x96xbf16, #tpu.memory_space<vmem>>, %arg3: memref<1x96xf32, #tpu.memory_space<vmem>>, %arg4: memref<32x32xbf16, #tpu.memory_space<vmem>>, %arg5: memref<1x32xf32, #tpu.memory_space<vmem>>, %arg6: memref<16x32xf32, #tpu.memory_space<vmem>>) attributes {dimension_semantics = [#tpu.dimension_semantics<parallel>], iteration_bounds = array<i64: 1>, scalar_prefetch = 0 : i64, scratch_operands = 0 : i64, tpu.core_type = #tpu.core_type<tc>, window_params = [{transform_indices = @transform_0, window_bounds = array<i64: 16, 32>}, {pipeline_mode = #tpu.pipeline_mode<synchronous>, transform_indices = @transform_1, window_bounds = array<i64: 32, 96>}, {pipeline_mode = #tpu.pipeline_mode<synchronous>, transform_indices = @transform_2, window_bounds = array<i64: 1, 96>}, {pipeline_mode = #tpu.pipeline_mode<synchronous>, transform_indices = @transform_3, window_bounds = array<i64: 32, 32>}, {pipeline_mode = #tpu.pipeline_mode<synchronous>, transform_indices = @transform_4, window_bounds = array<i64: 1, 32>}, {transform_indices = @transform_5, window_bounds = array<i64: 16, 32>}]} {
    %c0 = arith.constant 0 : index
    %c0_0 = arith.constant 0 : index
    %0 = vector.load %arg1[%c0, %c0_0] : memref<16x32xf32, #tpu.memory_space<vmem>>, vector<16x32xf32>
    %1 = arith.truncf %0 : vector<16x32xf32> to vector<16x32xbf16>
    %c0_1 = arith.constant 0 : index
    %c0_2 = arith.constant 0 : index
    %2 = vector.load %arg2[%c0_1, %c0_2] : memref<32x96xbf16, #tpu.memory_space<vmem>>, vector<32x96xbf16>
    %cst = arith.constant dense<0.000000e+00> : vector<16x96xf32>
    %3 = tpu.matmul %1, %2, %cst {dimension_numbers = #tpu.dot_dimension_numbers<[1], [0], [0], [1], [0, 0, 1, 1], [], []>} : vector<16x32xbf16>, vector<32x96xbf16>, vector<16x96xf32> -> vector<16x96xf32>
    %c0_3 = arith.constant 0 : index
    %c0_4 = arith.constant 0 : index
    %4 = vector.load %arg3[%c0_3, %c0_4] : memref<1x96xf32, #tpu.memory_space<vmem>>, vector<1x96xf32>
    %5 = vector.broadcast %4 : vector<1x96xf32> to vector<16x96xf32>
    %6 = arith.addf %3, %5 : vector<16x96xf32>
    %7 = vector.shape_cast %6 : vector<16x96xf32> to vector<2x8x96xf32>
    %c0_5 = arith.constant 0 : index
    %c0_6 = arith.constant 0 : index
    %8 = vector.load %arg4[%c0_5, %c0_6] : memref<32x32xbf16, #tpu.memory_space<vmem>>, vector<32x32xbf16>
    %cst_7 = arith.constant 0.000000e+00 : f32
    %9 = vector.broadcast %cst_7 : f32 to vector<16x32xf32>
    %10 = vector.extract_strided_slice %7 {offsets = [0, 0, 0], sizes = [2, 8, 4], strides = [1, 1, 1]} : vector<2x8x96xf32> to vector<2x8x4xf32>
    %cst_8 = arith.constant 5.000000e-01 : f32
    %11 = vector.broadcast %cst_8 : f32 to vector<2x8x4xf32>
    %12 = arith.mulf %10, %11 : vector<2x8x4xf32>
    %13 = arith.truncf %12 : vector<2x8x4xf32> to vector<2x8x4xbf16>
    %14 = vector.extract_strided_slice %7 {offsets = [0, 0, 32], sizes = [2, 8, 4], strides = [1, 1, 1]} : vector<2x8x96xf32> to vector<2x8x4xf32>
    %15 = arith.truncf %14 : vector<2x8x4xf32> to vector<2x8x4xbf16>
    %16 = vector.extract_strided_slice %7 {offsets = [0, 0, 64], sizes = [2, 8, 4], strides = [1, 1, 1]} : vector<2x8x96xf32> to vector<2x8x4xf32>
    %17 = arith.truncf %16 : vector<2x8x4xf32> to vector<2x8x4xbf16>
    "tpu.trace_start"() <{level = 10 : i32, message = "bqd,bkd->bqk"}> : () -> ()
    %cst_9 = arith.constant dense<0.000000e+00> : vector<2x8x8xf32>
    %18 = tpu.matmul %13, %15, %cst_9 {dimension_numbers = #tpu.dot_dimension_numbers<[2], [2], [1], [1], [0, 0, 0, 1, 1, 1], [0], [0]>} : vector<2x8x4xbf16>, vector<2x8x4xbf16>, vector<2x8x8xf32> -> vector<2x8x8xf32>
    "tpu.trace_stop"() : () -> ()
    %cst_10 = arith.constant dense<0xFF800000> : vector<2x8xf32>
    %19 = vector.multi_reduction <maximumf>, %18, %cst_10 [2] : vector<2x8x8xf32> to vector<2x8xf32>
    %20 = vector.shape_cast %19 : vector<2x8xf32> to vector<2x8x1xf32>
    %21 = vector.broadcast %20 : vector<2x8x1xf32> to vector<2x8x8xf32>
    %22 = arith.subf %18, %21 : vector<2x8x8xf32>
    %23 = math.exp %22 : vector<2x8x8xf32>
    %cst_11 = arith.constant dense<0.000000e+00> : vector<2x8xf32>
    %24 = vector.multi_reduction <add>, %23, %cst_11 [2] : vector<2x8x8xf32> to vector<2x8xf32>
    %25 = vector.shape_cast %24 : vector<2x8xf32> to vector<2x8x1xf32>
    %26 = tpu.reciprocal %25 {approx = true} : vector<2x8x1xf32> -> vector<2x8x1xf32>
    %27 = vector.broadcast %26 : vector<2x8x1xf32> to vector<2x8x8xf32>
    %28 = arith.mulf %23, %27 : vector<2x8x8xf32>
    %29 = arith.truncf %28 : vector<2x8x8xf32> to vector<2x8x8xbf16>
    "tpu.trace_start"() <{level = 10 : i32, message = "bqk,bkd->bqd"}> : () -> ()
    %cst_12 = arith.constant dense<0.000000e+00> : vector<2x8x4xf32>
    %30 = tpu.matmul %29, %17, %cst_12 {dimension_numbers = #tpu.dot_dimension_numbers<[2], [1], [1], [2], [0, 0, 0, 1, 1, 2], [0], [0]>} : vector<2x8x8xbf16>, vector<2x8x4xbf16>, vector<2x8x4xf32> -> vector<2x8x4xf32>
    "tpu.trace_stop"() : () -> ()
    %31 = vector.shape_cast %30 : vector<2x8x4xf32> to vector<16x4xf32>
    %32 = arith.truncf %31 : vector<16x4xf32> to vector<16x4xbf16>
    %33 = vector.extract_strided_slice %8 {offsets = [0, 0], sizes = [4, 32], strides = [1, 1]} : vector<32x32xbf16> to vector<4x32xbf16>
    %cst_13 = arith.constant dense<0.000000e+00> : vector<16x32xf32>
    %34 = tpu.matmul %32, %33, %cst_13 {dimension_numbers = #tpu.dot_dimension_numbers<[1], [0], [0], [1], [0, 0, 1, 1], [], []>} : vector<16x4xbf16>, vector<4x32xbf16>, vector<16x32xf32> -> vector<16x32xf32>
    %35 = arith.addf %9, %34 : vector<16x32xf32>
    %36 = vector.extract_strided_slice %7 {offsets = [0, 0, 4], sizes = [2, 8, 4], strides = [1, 1, 1]} : vector<2x8x96xf32> to vector<2x8x4xf32>
    %cst_14 = arith.constant 5.000000e-01 : f32
    %37 = vector.broadcast %cst_14 : f32 to vector<2x8x4xf32>
    %38 = arith.mulf %36, %37 : vector<2x8x4xf32>
    %39 = arith.truncf %38 : vector<2x8x4xf32> to vector<2x8x4xbf16>
    %40 = vector.extract_strided_slice %7 {offsets = [0, 0, 36], sizes = [2, 8, 4], strides = [1, 1, 1]} : vector<2x8x96xf32> to vector<2x8x4xf32>
    %41 = arith.truncf %40 : vector<2x8x4xf32> to vector<2x8x4xbf16>
    %42 = vector.extract_strided_slice %7 {offsets = [0, 0, 68], sizes = [2, 8, 4], strides = [1, 1, 1]} : vector<2x8x96xf32> to vector<2x8x4xf32>
    %43 = arith.truncf %42 : vector<2x8x4xf32> to vector<2x8x4xbf16>
    "tpu.trace_start"() <{level = 10 : i32, message = "bqd,bkd->bqk"}> : () -> ()
    %cst_15 = arith.constant dense<0.000000e+00> : vector<2x8x8xf32>
    %44 = tpu.matmul %39, %41, %cst_15 {dimension_numbers = #tpu.dot_dimension_numbers<[2], [2], [1], [1], [0, 0, 0, 1, 1, 1], [0], [0]>} : vector<2x8x4xbf16>, vector<2x8x4xbf16>, vector<2x8x8xf32> -> vector<2x8x8xf32>
    "tpu.trace_stop"() : () -> ()
    %cst_16 = arith.constant dense<0xFF800000> : vector<2x8xf32>
    %45 = vector.multi_reduction <maximumf>, %44, %cst_16 [2] : vector<2x8x8xf32> to vector<2x8xf32>
    %46 = vector.shape_cast %45 : vector<2x8xf32> to vector<2x8x1xf32>
    %47 = vector.broadcast %46 : vector<2x8x1xf32> to vector<2x8x8xf32>
    %48 = arith.subf %44, %47 : vector<2x8x8xf32>
    %49 = math.exp %48 : vector<2x8x8xf32>
    %cst_17 = arith.constant dense<0.000000e+00> : vector<2x8xf32>
    %50 = vector.multi_reduction <add>, %49, %cst_17 [2] : vector<2x8x8xf32> to vector<2x8xf32>
    %51 = vector.shape_cast %50 : vector<2x8xf32> to vector<2x8x1xf32>
    %52 = tpu.reciprocal %51 {approx = true} : vector<2x8x1xf32> -> vector<2x8x1xf32>
    %53 = vector.broadcast %52 : vector<2x8x1xf32> to vector<2x8x8xf32>
    %54 = arith.mulf %49, %53 : vector<2x8x8xf32>
    %55 = arith.truncf %54 : vector<2x8x8xf32> to vector<2x8x8xbf16>
    "tpu.trace_start"() <{level = 10 : i32, message = "bqk,bkd->bqd"}> : () -> ()
    %cst_18 = arith.constant dense<0.000000e+00> : vector<2x8x4xf32>
    %56 = tpu.matmul %55, %43, %cst_18 {dimension_numbers = #tpu.dot_dimension_numbers<[2], [1], [1], [2], [0, 0, 0, 1, 1, 2], [0], [0]>} : vector<2x8x8xbf16>, vector<2x8x4xbf16>, vector<2x8x4xf32> -> vector<2x8x4xf32>
    "tpu.trace_stop"() : () -> ()
    %57 = vector.shape_cast %56 : vector<2x8x4xf32> to vector<16x4xf32>
    %58 = arith.truncf %57 : vector<16x4xf32> to vector<16x4xbf16>
    %59 = vector.extract_strided_slice %8 {offsets = [4, 0], sizes = [4, 32], strides = [1, 1]} : vector<32x32xbf16> to vector<4x32xbf16>
    %cst_19 = arith.constant dense<0.000000e+00> : vector<16x32xf32>
    %60 = tpu.matmul %58, %59, %cst_19 {dimension_numbers = #tpu.dot_dimension_numbers<[1], [0], [0], [1], [0, 0, 1, 1], [], []>} : vector<16x4xbf16>, vector<4x32xbf16>, vector<16x32xf32> -> vector<16x32xf32>
    %61 = arith.addf %35, %60 : vector<16x32xf32>
    %62 = vector.extract_strided_slice %7 {offsets = [0, 0, 8], sizes = [2, 8, 4], strides = [1, 1, 1]} : vector<2x8x96xf32> to vector<2x8x4xf32>
    %cst_20 = arith.constant 5.000000e-01 : f32
    %63 = vector.broadcast %cst_20 : f32 to vector<2x8x4xf32>
    %64 = arith.mulf %62, %63 : vector<2x8x4xf32>
    %65 = arith.truncf %64 : vector<2x8x4xf32> to vector<2x8x4xbf16>
    %66 = vector.extract_strided_slice %7 {offsets = [0, 0, 40], sizes = [2, 8, 4], strides = [1, 1, 1]} : vector<2x8x96xf32> to vector<2x8x4xf32>
    %67 = arith.truncf %66 : vector<2x8x4xf32> to vector<2x8x4xbf16>
    %68 = vector.extract_strided_slice %7 {offsets = [0, 0, 72], sizes = [2, 8, 4], strides = [1, 1, 1]} : vector<2x8x96xf32> to vector<2x8x4xf32>
    %69 = arith.truncf %68 : vector<2x8x4xf32> to vector<2x8x4xbf16>
    "tpu.trace_start"() <{level = 10 : i32, message = "bqd,bkd->bqk"}> : () -> ()
    %cst_21 = arith.constant dense<0.000000e+00> : vector<2x8x8xf32>
    %70 = tpu.matmul %65, %67, %cst_21 {dimension_numbers = #tpu.dot_dimension_numbers<[2], [2], [1], [1], [0, 0, 0, 1, 1, 1], [0], [0]>} : vector<2x8x4xbf16>, vector<2x8x4xbf16>, vector<2x8x8xf32> -> vector<2x8x8xf32>
    "tpu.trace_stop"() : () -> ()
    %cst_22 = arith.constant dense<0xFF800000> : vector<2x8xf32>
    %71 = vector.multi_reduction <maximumf>, %70, %cst_22 [2] : vector<2x8x8xf32> to vector<2x8xf32>
    %72 = vector.shape_cast %71 : vector<2x8xf32> to vector<2x8x1xf32>
    %73 = vector.broadcast %72 : vector<2x8x1xf32> to vector<2x8x8xf32>
    %74 = arith.subf %70, %73 : vector<2x8x8xf32>
    %75 = math.exp %74 : vector<2x8x8xf32>
    %cst_23 = arith.constant dense<0.000000e+00> : vector<2x8xf32>
    %76 = vector.multi_reduction <add>, %75, %cst_23 [2] : vector<2x8x8xf32> to vector<2x8xf32>
    %77 = vector.shape_cast %76 : vector<2x8xf32> to vector<2x8x1xf32>
    %78 = tpu.reciprocal %77 {approx = true} : vector<2x8x1xf32> -> vector<2x8x1xf32>
    %79 = vector.broadcast %78 : vector<2x8x1xf32> to vector<2x8x8xf32>
    %80 = arith.mulf %75, %79 : vector<2x8x8xf32>
    %81 = arith.truncf %80 : vector<2x8x8xf32> to vector<2x8x8xbf16>
    "tpu.trace_start"() <{level = 10 : i32, message = "bqk,bkd->bqd"}> : () -> ()
    %cst_24 = arith.constant dense<0.000000e+00> : vector<2x8x4xf32>
    %82 = tpu.matmul %81, %69, %cst_24 {dimension_numbers = #tpu.dot_dimension_numbers<[2], [1], [1], [2], [0, 0, 0, 1, 1, 2], [0], [0]>} : vector<2x8x8xbf16>, vector<2x8x4xbf16>, vector<2x8x4xf32> -> vector<2x8x4xf32>
    "tpu.trace_stop"() : () -> ()
    %83 = vector.shape_cast %82 : vector<2x8x4xf32> to vector<16x4xf32>
    %84 = arith.truncf %83 : vector<16x4xf32> to vector<16x4xbf16>
    %85 = vector.extract_strided_slice %8 {offsets = [8, 0], sizes = [4, 32], strides = [1, 1]} : vector<32x32xbf16> to vector<4x32xbf16>
    %cst_25 = arith.constant dense<0.000000e+00> : vector<16x32xf32>
    %86 = tpu.matmul %84, %85, %cst_25 {dimension_numbers = #tpu.dot_dimension_numbers<[1], [0], [0], [1], [0, 0, 1, 1], [], []>} : vector<16x4xbf16>, vector<4x32xbf16>, vector<16x32xf32> -> vector<16x32xf32>
    %87 = arith.addf %61, %86 : vector<16x32xf32>
    %88 = vector.extract_strided_slice %7 {offsets = [0, 0, 12], sizes = [2, 8, 4], strides = [1, 1, 1]} : vector<2x8x96xf32> to vector<2x8x4xf32>
    %cst_26 = arith.constant 5.000000e-01 : f32
    %89 = vector.broadcast %cst_26 : f32 to vector<2x8x4xf32>
    %90 = arith.mulf %88, %89 : vector<2x8x4xf32>
    %91 = arith.truncf %90 : vector<2x8x4xf32> to vector<2x8x4xbf16>
    %92 = vector.extract_strided_slice %7 {offsets = [0, 0, 44], sizes = [2, 8, 4], strides = [1, 1, 1]} : vector<2x8x96xf32> to vector<2x8x4xf32>
    %93 = arith.truncf %92 : vector<2x8x4xf32> to vector<2x8x4xbf16>
    %94 = vector.extract_strided_slice %7 {offsets = [0, 0, 76], sizes = [2, 8, 4], strides = [1, 1, 1]} : vector<2x8x96xf32> to vector<2x8x4xf32>
    %95 = arith.truncf %94 : vector<2x8x4xf32> to vector<2x8x4xbf16>
    "tpu.trace_start"() <{level = 10 : i32, message = "bqd,bkd->bqk"}> : () -> ()
    %cst_27 = arith.constant dense<0.000000e+00> : vector<2x8x8xf32>
    %96 = tpu.matmul %91, %93, %cst_27 {dimension_numbers = #tpu.dot_dimension_numbers<[2], [2], [1], [1], [0, 0, 0, 1, 1, 1], [0], [0]>} : vector<2x8x4xbf16>, vector<2x8x4xbf16>, vector<2x8x8xf32> -> vector<2x8x8xf32>
    "tpu.trace_stop"() : () -> ()
    %cst_28 = arith.constant dense<0xFF800000> : vector<2x8xf32>
    %97 = vector.multi_reduction <maximumf>, %96, %cst_28 [2] : vector<2x8x8xf32> to vector<2x8xf32>
    %98 = vector.shape_cast %97 : vector<2x8xf32> to vector<2x8x1xf32>
    %99 = vector.broadcast %98 : vector<2x8x1xf32> to vector<2x8x8xf32>
    %100 = arith.subf %96, %99 : vector<2x8x8xf32>
    %101 = math.exp %100 : vector<2x8x8xf32>
    %cst_29 = arith.constant dense<0.000000e+00> : vector<2x8xf32>
    %102 = vector.multi_reduction <add>, %101, %cst_29 [2] : vector<2x8x8xf32> to vector<2x8xf32>
    %103 = vector.shape_cast %102 : vector<2x8xf32> to vector<2x8x1xf32>
    %104 = tpu.reciprocal %103 {approx = true} : vector<2x8x1xf32> -> vector<2x8x1xf32>
    %105 = vector.broadcast %104 : vector<2x8x1xf32> to vector<2x8x8xf32>
    %106 = arith.mulf %101, %105 : vector<2x8x8xf32>
    %107 = arith.truncf %106 : vector<2x8x8xf32> to vector<2x8x8xbf16>
    "tpu.trace_start"() <{level = 10 : i32, message = "bqk,bkd->bqd"}> : () -> ()
    %cst_30 = arith.constant dense<0.000000e+00> : vector<2x8x4xf32>
    %108 = tpu.matmul %107, %95, %cst_30 {dimension_numbers = #tpu.dot_dimension_numbers<[2], [1], [1], [2], [0, 0, 0, 1, 1, 2], [0], [0]>} : vector<2x8x8xbf16>, vector<2x8x4xbf16>, vector<2x8x4xf32> -> vector<2x8x4xf32>
    "tpu.trace_stop"() : () -> ()
    %109 = vector.shape_cast %108 : vector<2x8x4xf32> to vector<16x4xf32>
    %110 = arith.truncf %109 : vector<16x4xf32> to vector<16x4xbf16>
    %111 = vector.extract_strided_slice %8 {offsets = [12, 0], sizes = [4, 32], strides = [1, 1]} : vector<32x32xbf16> to vector<4x32xbf16>
    %cst_31 = arith.constant dense<0.000000e+00> : vector<16x32xf32>
    %112 = tpu.matmul %110, %111, %cst_31 {dimension_numbers = #tpu.dot_dimension_numbers<[1], [0], [0], [1], [0, 0, 1, 1], [], []>} : vector<16x4xbf16>, vector<4x32xbf16>, vector<16x32xf32> -> vector<16x32xf32>
    %113 = arith.addf %87, %112 : vector<16x32xf32>
    %114 = vector.extract_strided_slice %7 {offsets = [0, 0, 16], sizes = [2, 8, 4], strides = [1, 1, 1]} : vector<2x8x96xf32> to vector<2x8x4xf32>
    %cst_32 = arith.constant 5.000000e-01 : f32
    %115 = vector.broadcast %cst_32 : f32 to vector<2x8x4xf32>
    %116 = arith.mulf %114, %115 : vector<2x8x4xf32>
    %117 = arith.truncf %116 : vector<2x8x4xf32> to vector<2x8x4xbf16>
    %118 = vector.extract_strided_slice %7 {offsets = [0, 0, 48], sizes = [2, 8, 4], strides = [1, 1, 1]} : vector<2x8x96xf32> to vector<2x8x4xf32>
    %119 = arith.truncf %118 : vector<2x8x4xf32> to vector<2x8x4xbf16>
    %120 = vector.extract_strided_slice %7 {offsets = [0, 0, 80], sizes = [2, 8, 4], strides = [1, 1, 1]} : vector<2x8x96xf32> to vector<2x8x4xf32>
    %121 = arith.truncf %120 : vector<2x8x4xf32> to vector<2x8x4xbf16>
    "tpu.trace_start"() <{level = 10 : i32, message = "bqd,bkd->bqk"}> : () -> ()
    %cst_33 = arith.constant dense<0.000000e+00> : vector<2x8x8xf32>
    %122 = tpu.matmul %117, %119, %cst_33 {dimension_numbers = #tpu.dot_dimension_numbers<[2], [2], [1], [1], [0, 0, 0, 1, 1, 1], [0], [0]>} : vector<2x8x4xbf16>, vector<2x8x4xbf16>, vector<2x8x8xf32> -> vector<2x8x8xf32>
    "tpu.trace_stop"() : () -> ()
    %cst_34 = arith.constant dense<0xFF800000> : vector<2x8xf32>
    %123 = vector.multi_reduction <maximumf>, %122, %cst_34 [2] : vector<2x8x8xf32> to vector<2x8xf32>
    %124 = vector.shape_cast %123 : vector<2x8xf32> to vector<2x8x1xf32>
    %125 = vector.broadcast %124 : vector<2x8x1xf32> to vector<2x8x8xf32>
    %126 = arith.subf %122, %125 : vector<2x8x8xf32>
    %127 = math.exp %126 : vector<2x8x8xf32>
    %cst_35 = arith.constant dense<0.000000e+00> : vector<2x8xf32>
    %128 = vector.multi_reduction <add>, %127, %cst_35 [2] : vector<2x8x8xf32> to vector<2x8xf32>
    %129 = vector.shape_cast %128 : vector<2x8xf32> to vector<2x8x1xf32>
    %130 = tpu.reciprocal %129 {approx = true} : vector<2x8x1xf32> -> vector<2x8x1xf32>
    %131 = vector.broadcast %130 : vector<2x8x1xf32> to vector<2x8x8xf32>
    %132 = arith.mulf %127, %131 : vector<2x8x8xf32>
    %133 = arith.truncf %132 : vector<2x8x8xf32> to vector<2x8x8xbf16>
    "tpu.trace_start"() <{level = 10 : i32, message = "bqk,bkd->bqd"}> : () -> ()
    %cst_36 = arith.constant dense<0.000000e+00> : vector<2x8x4xf32>
    %134 = tpu.matmul %133, %121, %cst_36 {dimension_numbers = #tpu.dot_dimension_numbers<[2], [1], [1], [2], [0, 0, 0, 1, 1, 2], [0], [0]>} : vector<2x8x8xbf16>, vector<2x8x4xbf16>, vector<2x8x4xf32> -> vector<2x8x4xf32>
    "tpu.trace_stop"() : () -> ()
    %135 = vector.shape_cast %134 : vector<2x8x4xf32> to vector<16x4xf32>
    %136 = arith.truncf %135 : vector<16x4xf32> to vector<16x4xbf16>
    %137 = vector.extract_strided_slice %8 {offsets = [16, 0], sizes = [4, 32], strides = [1, 1]} : vector<32x32xbf16> to vector<4x32xbf16>
    %cst_37 = arith.constant dense<0.000000e+00> : vector<16x32xf32>
    %138 = tpu.matmul %136, %137, %cst_37 {dimension_numbers = #tpu.dot_dimension_numbers<[1], [0], [0], [1], [0, 0, 1, 1], [], []>} : vector<16x4xbf16>, vector<4x32xbf16>, vector<16x32xf32> -> vector<16x32xf32>
    %139 = arith.addf %113, %138 : vector<16x32xf32>
    %140 = vector.extract_strided_slice %7 {offsets = [0, 0, 20], sizes = [2, 8, 4], strides = [1, 1, 1]} : vector<2x8x96xf32> to vector<2x8x4xf32>
    %cst_38 = arith.constant 5.000000e-01 : f32
    %141 = vector.broadcast %cst_38 : f32 to vector<2x8x4xf32>
    %142 = arith.mulf %140, %141 : vector<2x8x4xf32>
    %143 = arith.truncf %142 : vector<2x8x4xf32> to vector<2x8x4xbf16>
    %144 = vector.extract_strided_slice %7 {offsets = [0, 0, 52], sizes = [2, 8, 4], strides = [1, 1, 1]} : vector<2x8x96xf32> to vector<2x8x4xf32>
    %145 = arith.truncf %144 : vector<2x8x4xf32> to vector<2x8x4xbf16>
    %146 = vector.extract_strided_slice %7 {offsets = [0, 0, 84], sizes = [2, 8, 4], strides = [1, 1, 1]} : vector<2x8x96xf32> to vector<2x8x4xf32>
    %147 = arith.truncf %146 : vector<2x8x4xf32> to vector<2x8x4xbf16>
    "tpu.trace_start"() <{level = 10 : i32, message = "bqd,bkd->bqk"}> : () -> ()
    %cst_39 = arith.constant dense<0.000000e+00> : vector<2x8x8xf32>
    %148 = tpu.matmul %143, %145, %cst_39 {dimension_numbers = #tpu.dot_dimension_numbers<[2], [2], [1], [1], [0, 0, 0, 1, 1, 1], [0], [0]>} : vector<2x8x4xbf16>, vector<2x8x4xbf16>, vector<2x8x8xf32> -> vector<2x8x8xf32>
    "tpu.trace_stop"() : () -> ()
    %cst_40 = arith.constant dense<0xFF800000> : vector<2x8xf32>
    %149 = vector.multi_reduction <maximumf>, %148, %cst_40 [2] : vector<2x8x8xf32> to vector<2x8xf32>
    %150 = vector.shape_cast %149 : vector<2x8xf32> to vector<2x8x1xf32>
    %151 = vector.broadcast %150 : vector<2x8x1xf32> to vector<2x8x8xf32>
    %152 = arith.subf %148, %151 : vector<2x8x8xf32>
    %153 = math.exp %152 : vector<2x8x8xf32>
    %cst_41 = arith.constant dense<0.000000e+00> : vector<2x8xf32>
    %154 = vector.multi_reduction <add>, %153, %cst_41 [2] : vector<2x8x8xf32> to vector<2x8xf32>
    %155 = vector.shape_cast %154 : vector<2x8xf32> to vector<2x8x1xf32>
    %156 = tpu.reciprocal %155 {approx = true} : vector<2x8x1xf32> -> vector<2x8x1xf32>
    %157 = vector.broadcast %156 : vector<2x8x1xf32> to vector<2x8x8xf32>
    %158 = arith.mulf %153, %157 : vector<2x8x8xf32>
    %159 = arith.truncf %158 : vector<2x8x8xf32> to vector<2x8x8xbf16>
    "tpu.trace_start"() <{level = 10 : i32, message = "bqk,bkd->bqd"}> : () -> ()
    %cst_42 = arith.constant dense<0.000000e+00> : vector<2x8x4xf32>
    %160 = tpu.matmul %159, %147, %cst_42 {dimension_numbers = #tpu.dot_dimension_numbers<[2], [1], [1], [2], [0, 0, 0, 1, 1, 2], [0], [0]>} : vector<2x8x8xbf16>, vector<2x8x4xbf16>, vector<2x8x4xf32> -> vector<2x8x4xf32>
    "tpu.trace_stop"() : () -> ()
    %161 = vector.shape_cast %160 : vector<2x8x4xf32> to vector<16x4xf32>
    %162 = arith.truncf %161 : vector<16x4xf32> to vector<16x4xbf16>
    %163 = vector.extract_strided_slice %8 {offsets = [20, 0], sizes = [4, 32], strides = [1, 1]} : vector<32x32xbf16> to vector<4x32xbf16>
    %cst_43 = arith.constant dense<0.000000e+00> : vector<16x32xf32>
    %164 = tpu.matmul %162, %163, %cst_43 {dimension_numbers = #tpu.dot_dimension_numbers<[1], [0], [0], [1], [0, 0, 1, 1], [], []>} : vector<16x4xbf16>, vector<4x32xbf16>, vector<16x32xf32> -> vector<16x32xf32>
    %165 = arith.addf %139, %164 : vector<16x32xf32>
    %166 = vector.extract_strided_slice %7 {offsets = [0, 0, 24], sizes = [2, 8, 4], strides = [1, 1, 1]} : vector<2x8x96xf32> to vector<2x8x4xf32>
    %cst_44 = arith.constant 5.000000e-01 : f32
    %167 = vector.broadcast %cst_44 : f32 to vector<2x8x4xf32>
    %168 = arith.mulf %166, %167 : vector<2x8x4xf32>
    %169 = arith.truncf %168 : vector<2x8x4xf32> to vector<2x8x4xbf16>
    %170 = vector.extract_strided_slice %7 {offsets = [0, 0, 56], sizes = [2, 8, 4], strides = [1, 1, 1]} : vector<2x8x96xf32> to vector<2x8x4xf32>
    %171 = arith.truncf %170 : vector<2x8x4xf32> to vector<2x8x4xbf16>
    %172 = vector.extract_strided_slice %7 {offsets = [0, 0, 88], sizes = [2, 8, 4], strides = [1, 1, 1]} : vector<2x8x96xf32> to vector<2x8x4xf32>
    %173 = arith.truncf %172 : vector<2x8x4xf32> to vector<2x8x4xbf16>
    "tpu.trace_start"() <{level = 10 : i32, message = "bqd,bkd->bqk"}> : () -> ()
    %cst_45 = arith.constant dense<0.000000e+00> : vector<2x8x8xf32>
    %174 = tpu.matmul %169, %171, %cst_45 {dimension_numbers = #tpu.dot_dimension_numbers<[2], [2], [1], [1], [0, 0, 0, 1, 1, 1], [0], [0]>} : vector<2x8x4xbf16>, vector<2x8x4xbf16>, vector<2x8x8xf32> -> vector<2x8x8xf32>
    "tpu.trace_stop"() : () -> ()
    %cst_46 = arith.constant dense<0xFF800000> : vector<2x8xf32>
    %175 = vector.multi_reduction <maximumf>, %174, %cst_46 [2] : vector<2x8x8xf32> to vector<2x8xf32>
    %176 = vector.shape_cast %175 : vector<2x8xf32> to vector<2x8x1xf32>
    %177 = vector.broadcast %176 : vector<2x8x1xf32> to vector<2x8x8xf32>
    %178 = arith.subf %174, %177 : vector<2x8x8xf32>
    %179 = math.exp %178 : vector<2x8x8xf32>
    %cst_47 = arith.constant dense<0.000000e+00> : vector<2x8xf32>
    %180 = vector.multi_reduction <add>, %179, %cst_47 [2] : vector<2x8x8xf32> to vector<2x8xf32>
    %181 = vector.shape_cast %180 : vector<2x8xf32> to vector<2x8x1xf32>
    %182 = tpu.reciprocal %181 {approx = true} : vector<2x8x1xf32> -> vector<2x8x1xf32>
    %183 = vector.broadcast %182 : vector<2x8x1xf32> to vector<2x8x8xf32>
    %184 = arith.mulf %179, %183 : vector<2x8x8xf32>
    %185 = arith.truncf %184 : vector<2x8x8xf32> to vector<2x8x8xbf16>
    "tpu.trace_start"() <{level = 10 : i32, message = "bqk,bkd->bqd"}> : () -> ()
    %cst_48 = arith.constant dense<0.000000e+00> : vector<2x8x4xf32>
    %186 = tpu.matmul %185, %173, %cst_48 {dimension_numbers = #tpu.dot_dimension_numbers<[2], [1], [1], [2], [0, 0, 0, 1, 1, 2], [0], [0]>} : vector<2x8x8xbf16>, vector<2x8x4xbf16>, vector<2x8x4xf32> -> vector<2x8x4xf32>
    "tpu.trace_stop"() : () -> ()
    %187 = vector.shape_cast %186 : vector<2x8x4xf32> to vector<16x4xf32>
    %188 = arith.truncf %187 : vector<16x4xf32> to vector<16x4xbf16>
    %189 = vector.extract_strided_slice %8 {offsets = [24, 0], sizes = [4, 32], strides = [1, 1]} : vector<32x32xbf16> to vector<4x32xbf16>
    %cst_49 = arith.constant dense<0.000000e+00> : vector<16x32xf32>
    %190 = tpu.matmul %188, %189, %cst_49 {dimension_numbers = #tpu.dot_dimension_numbers<[1], [0], [0], [1], [0, 0, 1, 1], [], []>} : vector<16x4xbf16>, vector<4x32xbf16>, vector<16x32xf32> -> vector<16x32xf32>
    %191 = arith.addf %165, %190 : vector<16x32xf32>
    %192 = vector.extract_strided_slice %7 {offsets = [0, 0, 28], sizes = [2, 8, 4], strides = [1, 1, 1]} : vector<2x8x96xf32> to vector<2x8x4xf32>
    %cst_50 = arith.constant 5.000000e-01 : f32
    %193 = vector.broadcast %cst_50 : f32 to vector<2x8x4xf32>
    %194 = arith.mulf %192, %193 : vector<2x8x4xf32>
    %195 = arith.truncf %194 : vector<2x8x4xf32> to vector<2x8x4xbf16>
    %196 = vector.extract_strided_slice %7 {offsets = [0, 0, 60], sizes = [2, 8, 4], strides = [1, 1, 1]} : vector<2x8x96xf32> to vector<2x8x4xf32>
    %197 = arith.truncf %196 : vector<2x8x4xf32> to vector<2x8x4xbf16>
    %198 = vector.extract_strided_slice %7 {offsets = [0, 0, 92], sizes = [2, 8, 4], strides = [1, 1, 1]} : vector<2x8x96xf32> to vector<2x8x4xf32>
    %199 = arith.truncf %198 : vector<2x8x4xf32> to vector<2x8x4xbf16>
    "tpu.trace_start"() <{level = 10 : i32, message = "bqd,bkd->bqk"}> : () -> ()
    %cst_51 = arith.constant dense<0.000000e+00> : vector<2x8x8xf32>
    %200 = tpu.matmul %195, %197, %cst_51 {dimension_numbers = #tpu.dot_dimension_numbers<[2], [2], [1], [1], [0, 0, 0, 1, 1, 1], [0], [0]>} : vector<2x8x4xbf16>, vector<2x8x4xbf16>, vector<2x8x8xf32> -> vector<2x8x8xf32>
    "tpu.trace_stop"() : () -> ()
    %cst_52 = arith.constant dense<0xFF800000> : vector<2x8xf32>
    %201 = vector.multi_reduction <maximumf>, %200, %cst_52 [2] : vector<2x8x8xf32> to vector<2x8xf32>
    %202 = vector.shape_cast %201 : vector<2x8xf32> to vector<2x8x1xf32>
    %203 = vector.broadcast %202 : vector<2x8x1xf32> to vector<2x8x8xf32>
    %204 = arith.subf %200, %203 : vector<2x8x8xf32>
    %205 = math.exp %204 : vector<2x8x8xf32>
    %cst_53 = arith.constant dense<0.000000e+00> : vector<2x8xf32>
    %206 = vector.multi_reduction <add>, %205, %cst_53 [2] : vector<2x8x8xf32> to vector<2x8xf32>
    %207 = vector.shape_cast %206 : vector<2x8xf32> to vector<2x8x1xf32>
    %208 = tpu.reciprocal %207 {approx = true} : vector<2x8x1xf32> -> vector<2x8x1xf32>
    %209 = vector.broadcast %208 : vector<2x8x1xf32> to vector<2x8x8xf32>
    %210 = arith.mulf %205, %209 : vector<2x8x8xf32>
    %211 = arith.truncf %210 : vector<2x8x8xf32> to vector<2x8x8xbf16>
    "tpu.trace_start"() <{level = 10 : i32, message = "bqk,bkd->bqd"}> : () -> ()
    %cst_54 = arith.constant dense<0.000000e+00> : vector<2x8x4xf32>
    %212 = tpu.matmul %211, %199, %cst_54 {dimension_numbers = #tpu.dot_dimension_numbers<[2], [1], [1], [2], [0, 0, 0, 1, 1, 2], [0], [0]>} : vector<2x8x8xbf16>, vector<2x8x4xbf16>, vector<2x8x4xf32> -> vector<2x8x4xf32>
    "tpu.trace_stop"() : () -> ()
    %213 = vector.shape_cast %212 : vector<2x8x4xf32> to vector<16x4xf32>
    %214 = arith.truncf %213 : vector<16x4xf32> to vector<16x4xbf16>
    %215 = vector.extract_strided_slice %8 {offsets = [28, 0], sizes = [4, 32], strides = [1, 1]} : vector<32x32xbf16> to vector<4x32xbf16>
    %cst_55 = arith.constant dense<0.000000e+00> : vector<16x32xf32>
    %216 = tpu.matmul %214, %215, %cst_55 {dimension_numbers = #tpu.dot_dimension_numbers<[1], [0], [0], [1], [0, 0, 1, 1], [], []>} : vector<16x4xbf16>, vector<4x32xbf16>, vector<16x32xf32> -> vector<16x32xf32>
    %217 = arith.addf %191, %216 : vector<16x32xf32>
    %c0_56 = arith.constant 0 : index
    %c0_57 = arith.constant 0 : index
    %218 = vector.load %arg5[%c0_56, %c0_57] : memref<1x32xf32, #tpu.memory_space<vmem>>, vector<1x32xf32>
    %219 = vector.broadcast %218 : vector<1x32xf32> to vector<16x32xf32>
    %220 = arith.addf %217, %219 : vector<16x32xf32>
    %c0_58 = arith.constant 0 : index
    %c0_59 = arith.constant 0 : index
    %221 = vector.load %arg6[%c0_58, %c0_59] : memref<16x32xf32, #tpu.memory_space<vmem>>, vector<16x32xf32>
    tpu.vector_store %arg6[%c0_58, %c0_59], %220 {strides = array<i32>} : memref<16x32xf32, #tpu.memory_space<vmem>>, vector<16x32xf32>,
    return
  }
  func.func @transform_0(%arg0: i32) -> (i32, i32) {
    %c0_i32 = arith.constant 0 : i32
    %c0_i32_0 = arith.constant 0 : i32
    return %arg0, %c0_i32 : i32, i32
  }
  func.func @transform_1(%arg0: i32) -> (i32, i32) {
    %c0_i32 = arith.constant 0 : i32
    %c0_i32_0 = arith.constant 0 : i32
    %c0_i32_1 = arith.constant 0 : i32
    return %c0_i32, %c0_i32_0 : i32, i32
  }
  func.func @transform_2(%arg0: i32) -> (i32, i32) {
    %c0_i32 = arith.constant 0 : i32
    %c0_i32_0 = arith.constant 0 : i32
    %c0_i32_1 = arith.constant 0 : i32
    return %c0_i32, %c0_i32_0 : i32, i32
  }
  func.func @transform_3(%arg0: i32) -> (i32, i32) {
    %c0_i32 = arith.constant 0 : i32
    %c0_i32_0 = arith.constant 0 : i32
    %c0_i32_1 = arith.constant 0 : i32
    return %c0_i32, %c0_i32_0 : i32, i32
  }
  func.func @transform_4(%arg0: i32) -> (i32, i32) {
    %c0_i32 = arith.constant 0 : i32
    %c0_i32_0 = arith.constant 0 : i32
    %c0_i32_1 = arith.constant 0 : i32
    return %c0_i32, %c0_i32_0 : i32, i32
  }
  func.func @transform_5(%arg0: i32) -> (i32, i32) {
    %c0_i32 = arith.constant 0 : i32
    %c0_i32_0 = arith.constant 0 : i32
    return %arg0, %c0_i32 : i32, i32
  }
}

</mosaic_0001>

<bundles_post_ra>
// kernel: tpu_custom_call.1
= control target key start
LH: loop header
LB: loop body
LE: loop exit
PB: predicated region body
PF: predicated region fallthrough
CT: control target
= control target key end

     0   :  { %10 = vsyncpa [#allocation3], 0  ;;  %s3408_s0 = inlined_call_operand.hbm [shape: f32[16,32], index: 0, kind: input, shape index: {}]   ;;  %s3409_s1 = inlined_call_operand.hbm [shape: bf16[32,96], index: 1, kind: input, shape index: {}]   ;;  %s3410_s2 = inlined_call_operand.vmem [shape: f32[1,96], index: 2, kind: input, shape index: {}]   ;;  %s3411_s3 = inlined_call_operand.hbm [shape: bf16[32,32], index: 3, kind: input, shape index: {}]   ;;  %s3412_s4 = inlined_call_operand.vmem [shape: f32[1,32], index: 4, kind: input, shape index: {}]   ;;  %s3413_s5 = inlined_call_operand.hbm [shape: f32[16,32], index: 5, kind: output, shape index: {}]  }
   0x1   :  { %11 = vsyncpa [#allocation6], 0 }
   0x2   :  { %12 = vsyncpa [#allocation4], 0  ;;  %s2925_s18 = smov [#allocation5]   ;;  %s2831_s22 = scalar_lea.hbm %s3409_s1, 256 }
   0x3   :  { %s30_s19 = sshll.u32 %s2925_s18, 4  ;;  %p2832_p0 = scmp.ne.s32.totalorder %s3409_s1, %s2831_s22  ;;  %s31_s19 = int_to_ptr.vmem [resolvable:$true] %s30_s19 }
   0x4   :  { %p2835_p1 = scmp.lt.u32.totalorder %s2831_s22, %s3409_s1 }
   0x6   :  { %p2837_p2 = pnand %p2835_p1, %p2832_p0 }
   0x8   :  { %2840 = shalt.err (!%p2837_p2)
}
   0x9   :  { %s2841_s27 = scalar_lea.vmem %s31_s19, 256  ;;  %p2846_p4 = scmp.lt.s32.totalorder %s31_s19, %s31_s19 }
   0xa   :  { %p2842_p3 = scmp.ne.s32.totalorder %s31_s19, %s2841_s27  ;;  %p2847_p5 = scmp.lt.s32.totalorder %s2841_s27, %s2841_s27 }
   0xc   :  { %p2848_p6 = por %p2847_p5, %p2846_p4 }
   0xe   :  { %p2849_p7 = pnand %p2848_p6, %p2842_p3 }
  0x10   :  { %2852 = shalt.err (!%p2849_p7)
}
  0x11   :  { %s2926_s28 = smov 64   ;;  %s2927_s29 = smov 4  }
  0x12   :  { %36 = dma.hbm_to_vmem [thread:$0]  %s3409_s1, 256, %s31_s19, [#allocation6], %s2926_s28, %s2926_s28, %s2927_s29  }
  0x13   :  { %s2928_s7 = smov [#allocation2]   ;;  %s2853_s11 = scalar_lea.hbm %s3408_s0, 256 }
  0x14   :  { %s18_s8 = sshll.u32 %s2928_s7, 4  ;;  %p2854_p8 = scmp.ne.s32.totalorder %s3408_s0, %s2853_s11  ;;  %s19_s8 = int_to_ptr.vmem [resolvable:$true] %s18_s8 }
  0x15   :  { %p2857_p9 = scmp.lt.u32.totalorder %s2853_s11, %s3408_s0 }
  0x17   :  { %p2859_p10 = pnand %p2857_p9, %p2854_p8 }
  0x19   :  { %2862 = shalt.err (!%p2859_p10)
}
  0x1a   :  { %s2863_s16 = scalar_lea.vmem %s19_s8, 256  ;;  %p2868_p12 = scmp.lt.s32.totalorder %s19_s8, %s19_s8 }
  0x1b   :  { %p2864_p11 = scmp.ne.s32.totalorder %s19_s8, %s2863_s16  ;;  %p2869_p13 = scmp.lt.s32.totalorder %s2863_s16, %s2863_s16 }
  0x1d   :  { %p2870_p0 = por %p2869_p13, %p2868_p12 }
  0x1f   :  { %p2871_p1 = pnand %p2870_p0, %p2864_p11 }
  0x21   :  { %2874 = shalt.err (!%p2871_p1)
}
  0x22   :  { %s2929_s1 = smov 128   ;;  %s2930_s17 = smov 8  }
  0x23   :  { %24 = dma.hbm_to_vmem [thread:$0]  %s3408_s0, 256, %s19_s8, [#allocation3], %s2929_s1, %s2929_s1, %s2930_s17  }
  0x24   :  { %s2931_s20 = smov [#allocation7]   ;;  %s2875_s24 = scalar_lea.hbm %s3411_s3, 256 }
  0x25   :  { %s44_s21 = sshll.u32 %s2931_s20, 4  ;;  %p2876_p2 = scmp.ne.s32.totalorder %s3411_s3, %s2875_s24  ;;  %s45_s21 = int_to_ptr.vmem [resolvable:$true] %s44_s21 }
  0x26   :  { %p2879_p3 = scmp.lt.u32.totalorder %s2875_s24, %s3411_s3 }
  0x28   :  { %p2881_p4 = pnand %p2879_p3, %p2876_p2 }
  0x2a   :  { %2884 = shalt.err (!%p2881_p4)
}
  0x2b   :  { %s2885_s6 = scalar_lea.vmem %s45_s21, 256  ;;  %p2890_p6 = scmp.lt.s32.totalorder %s45_s21, %s45_s21 }
  0x2c   :  { %p2886_p5 = scmp.ne.s32.totalorder %s45_s21, %s2885_s6  ;;  %p2891_p7 = scmp.lt.s32.totalorder %s2885_s6, %s2885_s6 }
  0x2e   :  { %p2892_p8 = por %p2891_p7, %p2890_p6 }
  0x30   :  { %p2893_p9 = pnand %p2892_p8, %p2886_p5 }
  0x32   :  { %2896 = shalt.err (!%p2893_p9)
}
  0x33   :  { %50 = dma.hbm_to_vmem [thread:$0]  %s3411_s3, 256, %s45_s21, [#allocation6], %s2926_s28, %s2926_s28, %s2927_s29  }
  0x34   :  { %2919 = dma.done.wait [#allocation3], 256  }
  0x35   :  { %2920 = vsyncadd [#allocation3], 4294967040 }
  0x36   :  { %2921 = dma.done.wait [#allocation6], 512  }
  0x37   :  { %2922 = vsyncadd [#allocation6], 4294966784  ;;  %v2932_v0 = vmov 0.0   ;;  %vm2933_vm0 = vmmov 0   ;;  %v2761_v1 = vld [vmem:[#allocation5] sm:$0xff]   ;;  %v2762_v2 = vld [vmem:[#allocation5 + $0x8] sm:$0xff]  }
  0x38   :  { %2481 = vmatprep.subr.bf16.mxu0 %v2932_v0  ;;  %2485 = vmatprep.mubr.msk.bf16.mxu0 %vm2933_vm0, %v2932_v0  ;;  %v63_v3 = vld [vmem:[#allocation2] sm:$0xff]  ;;  %v64_v4 = vld [vmem:[#allocation2 + $0x8] sm:$0xff]  ;;  %vm89_vm1 = vcmask 261120   ;;  %s2934_s8 = smov 96   ;;  %vm147_vm2 = vcmask 31744   ;;  %vm243_vm3 = vcmask 64512  }
  0x39   :  { %2489 = vmatprep.subr.bf16.mxu1 %v2932_v0  ;;  %2491 = vmatprep.mubr.msk.bf16.mxu1 %vm2933_vm0, %v2932_v0  ;;  %v65_v5 = vpack.c.bf16 %v64_v4, %v63_v3  ;;  %v2349_v6 = vld [vmem:[%s3410_s2] ss:$0 sm:$0xff]  ;;  %s2935_s2 = smov 92   ;;  %vm273_vm4 = vcmask 1043456   ;;  %s2937_s9 = smov 60   ;;  %vm596_vm5 = vcmask 1041408  }
  0x3a   :  { %2482 = vmatpush3.bf16.msra.mxu0 %v2761_v1  ;;  %s2938_s10 = smov 120   ;;  %s2939_s11 = smov 88  }
  0x3b   :  { %2483 = vmatprep.subr.bf16.mxu0 %v2932_v0  ;;  %s2940_s12 = smov 56   ;;  %s2941_s13 = smov 84  }
  0x3c   :  { %s2942_s14 = smov 116   ;;  %s2943_s15 = smov 52  }
  0x3d   :  { %s2944_s16 = smov 80   ;;  %s2945_s18 = smov 112  }
  0x3e   :  { %2484 = vmatpush3.bf16.msra.mxu0 %v2762_v2  ;;  %s2946_s19 = smov 48   ;;  %s2947_s20 = smov 76  }
  0x3f   :  { %2495 = vmatprep.subr.bf16.mxu0 %v2932_v0  ;;  %s2948_s21 = smov 108   ;;  %s2949_s22 = smov 44  }
  0x40   :  { %s2950_s23 = smov 72   ;;  %s2951_s24 = smov 104  }
  0x41   :  { %2486 = vmatmul.mubr.msk.bf16.vlgmr.msra.gmra.mrb[0].mxu0 %vm89_vm1, %v65_v5  ;;  %s2952_s25 = smov 40   ;;  %s2953_s26 = smov 68  }
  0x42   :  { %2497 = vmatprep.mubr.msk.bf16.mxu0 %vm2933_vm0, %v2932_v0  ;;  %s2954_s27 = smov 100   ;;  %s2955_s30 = smov 36  }
  0x43   :  { %s2956_s7 = smov [#allocation8]  }
  0x44   :  { %s2336_s3 = sshll.u32 %s2956_s7, 4  ;;  %s2337_s3 = int_to_ptr.vmem [resolvable:$true] %s2336_s3 }
  0x45   :  { %s2897_s29 = scalar_lea.vmem %s2337_s3, 256  ;;  %p2902_p11 = scmp.lt.s32.totalorder %s2337_s3, %s2337_s3 }
  0x46   :  { %p2898_p10 = scmp.ne.s32.totalorder %s2337_s3, %s2897_s29  ;;  %p2903_p12 = scmp.lt.s32.totalorder %s2897_s29, %s2897_s29 }
  0x48   :  { %p2904_p13 = por %p2903_p12, %p2902_p11 }
  0x4a   :  { %p2905_p0 = pnand %p2904_p13, %p2898_p10 }
 0x114   :  { %v127_v7 = vpop.f32.mrb[0].mxu0 }
 0x115   :  { %v128_v8 = vadd.f32 %v2349_v6, %v127_v7  ;;  %v2487_v9 = vpop.f32.mrb[1].mxu0 }
 0x116   :  { %v130_v10 = vpop.f32.mrb[2].mxu0 }
 0x117   :  { %v3046_v11 = vpack.c.bf16 %v128_v8, %v128_v8  ;;  %v131_v12 = vadd.f32 %v2349_v6, %v130_v10  ;;  %v2488_v13 = vpop.f32.mrb[3].mxu0  ;;  %v138_v17 = vmul.f32 0.5, %v128_v8 }
 0x119   :  { %145 = vrot.lane.b32.xlu0 %v3046_v11, %s2934_s8  ;;  %v3049_v14 = vpack.c.bf16 %v131_v12, %v131_v12  ;;  %v3055_v20 = vpack.c.bf16 %v138_v17, %v138_v17  ;;  %v139_v21 = vmul.f32 0.5, %v131_v12 }
 0x11b   :  { %v3062_v22 = vpack.c.bf16 %v139_v21, %v139_v21 }
 0x11d   :  { %195 = vrot.lane.b32.xlu0 %v3049_v14, %s2934_s8 }
 0x18b   :  { %v146_v15 = vpop.permute.xlu0 %145 }
 0x18c   :  { %v152_v16 = vsel %vm147_vm2, %v146_v15, 0 }
 0x18d   :  { %2490 = vmatpush3.bf16.xpose.msra.mxu1 %v152_v16 }
 0x18e   :  { %2501 = vmatprep.subr.bf16.mxu1 %v2932_v0 }
 0x18f   :  { %v196_v18 = vpop.permute.xlu0 %195 }
 0x190   :  { %v201_v19 = vsel %vm147_vm2, %v196_v18, 0 }
 0x191   :  { %2496 = vmatpush3.bf16.xpose.msra.mxu0 %v201_v19 }
 0x192   :  { %2507 = vmatprep.subr.bf16.mxu0 %v2932_v0 }
 0x194   :  { %2492 = vmatmul.mubr.msk.bf16.vlgmr.msra.gmra.mrb[0].mxu1 %vm147_vm2, %v3055_v20 }
 0x195   :  { %2503 = vmatprep.mubr.msk.bf16.mxu1 %vm2933_vm0, %v2932_v0 }
 0x198   :  { %2498 = vmatmul.mubr.msk.bf16.vlgmr.msra.gmra.mrb[4].mxu0 %vm147_vm2, %v3062_v22 }
 0x199   :  { %2509 = vmatprep.mubr.msk.bf16.mxu0 %vm2933_vm0, %v2932_v0 }
 0x267   :  { %v188_v23 = vpop.f32.mrb[0].mxu1 }
 0x268   :  { %v2493_v24 = vpop.f32.mrb[1].mxu1  ;;  %v244_v25 = vsel %vm243_vm3, %v188_v23, -inf }
 0x269   :  { %245 = vmax.xlane.f32.xlu1 %v244_v25  ;;  %v191_v26 = vpop.f32.mrb[2].mxu1 }
 0x26a   :  { %v2494_v27 = vpop.f32.mrb[3].mxu1 }
 0x26b   :  { %v237_v28 = vpop.f32.mrb[4].mxu0 }
 0x26c   :  { %v2499_v29 = vpop.f32.mrb[5].mxu0  ;;  %v247_v30 = vsel %vm243_vm3, %v237_v28, -inf }
 0x26d   :  { %248 = vmax.xlane.f32.xlu1 %v247_v30  ;;  %v240_v31 = vpop.f32.mrb[6].mxu0 }
 0x26e   :  { %v2500_v32 = vpop.f32.mrb[7].mxu0 }
 0x27e   :  { %268 = vrot.lane.b32.xlu1 %v3046_v11, %s2926_s28 }
 0x282   :  { %317 = vrot.lane.b32.xlu1 %v3049_v14, %s2926_s28  ;;  %s2936_s28 = smov 124  }
 0x286   :  { %369 = vrot.lane.b32.xlu1 %v3046_v11, %s2935_s2 }
 0x2f6   :  { %v246_v33 = vpop.xlane.xlu1 %245 }
 0x2f7   :  { %v250_v34 = vsub.f32 %v188_v23, %v246_v33 }
 0x2f9   :  { %v252_v35 = vmul.f32 1.442695, %v250_v34 }
 0x2fa   :  { %v249_v36 = vpop.xlane.xlu1 %248 }
 0x2fb   :  { %2767 = vpow2.f32 %v252_v35  ;;  %v251_v37 = vsub.f32 %v237_v28, %v249_v36  ;;  %v134_v35 = vld [vmem:[#allocation7] sm:$0xf] }
 0x2fc   :  { %v2361_v36 = vcombine.low %v134_v35, %v134_v35 }
 0x2fd   :  { %v254_v38 = vmul.f32 1.442695, %v251_v37 }
 0x2fe   :  { %v269_v39 = vpop.permute.xlu1 %268 }
 0x2ff   :  { %2769 = vpow2.f32 %v254_v38  ;;  %v275_v40 = vsel %vm273_vm4, %v269_v39, 0  ;;  %v592_v39 = vrot.slane %v2361_v36, 2 }
 0x300   :  { %2502 = vmatpush3.bf16.msra.mxu1 %v275_v40 }
 0x301   :  { %2513 = vmatprep.subr.bf16.mxu1 %v2932_v0 }
 0x302   :  { %v318_v41 = vpop.permute.xlu1 %317 }
 0x303   :  { %v323_v42 = vsel %vm273_vm4, %v318_v41, 0 }
 0x304   :  { %2508 = vmatpush3.bf16.msra.mxu0 %v323_v42 }
 0x305   :  { %v2768_v43 = vpop.eup %2767  ;;  %2519 = vmatprep.subr.bf16.mxu0 %v2932_v0 }
 0x306   :  { %v256_v44 = vsel %vm243_vm3, %v2768_v43, 0.0  ;;  %v370_v47 = vpop.permute.xlu1 %369 }
 0x307   :  { %257 = vadd.xlane.f32.xlu0 %v256_v44  ;;  %v375_v54 = vsel %vm147_vm2, %v370_v47, 0  ;;  %v645_v47 = vsel %vm596_vm5, %v134_v35, 0 }
 0x309   :  { %v2770_v45 = vpop.eup %2769 }
 0x30a   :  { %v259_v46 = vsel %vm243_vm3, %v2770_v45, 0.0 }
 0x30b   :  { %260 = vadd.xlane.f32.xlu1 %v259_v46 }
 0x31c   :  { %420 = vrot.lane.b32.xlu1 %v3049_v14, %s2935_s2 }
 0x31d   :  { %367 = vrot.lane.b32.xlu0 %v3055_v20, %s2936_s28 }
 0x320   :  { %418 = vrot.lane.b32.xlu1 %v3062_v22, %s2936_s28 }
 0x394   :  { %v258_v48 = vpop.xlane.xlu0 %257 }
 0x395   :  { %2771 = vrcp.f32 %v258_v48 }
 0x398   :  { %v261_v49 = vpop.xlane.xlu1 %260  ;;  %v368_v59 = vpop.permute.xlu0 %367 }
 0x399   :  { %2773 = vrcp.f32 %v261_v49 }
 0x39c   :  { %v421_v56 = vpop.permute.xlu1 %420 }
 0x39d   :  { %v426_v58 = vsel %vm147_vm2, %v421_v56, 0 }
 0x39f   :  { %v2772_v50 = vpop.eup %2771 }
 0x3a0   :  { %v264_v51 = vmul.f32 %v2772_v50, %v2768_v43  ;;  %v419_v60 = vpop.permute.xlu1 %418  ;;  %v598_v43 = vsel %vm596_vm5, %v592_v39, 0 }
 0x3a2   :  { %v266_v52 = vpack.c.bf16 %v264_v51, %v264_v51 }
 0x3a3   :  { %v2774_v53 = vpop.eup %2773 }
 0x3a4   :  { %v265_v55 = vmul.f32 %v2774_v53, %v2770_v45  ;;  %2504 = vmatmul.mubr.msk.bf16.vlgmr.msra.gmra.mrb[4].mxu1 %vm243_vm3, %v266_v52 }
 0x3a5   :  { %2514 = vmatpush3.bf16.xpose.msra.mxu1 %v375_v54  ;;  %2515 = vmatprep.mubr.msk.bf16.mxu1 %vm2933_vm0, %v2932_v0 }
 0x3a6   :  { %v267_v57 = vpack.c.bf16 %v265_v55, %v265_v55  ;;  %2525 = vmatprep.subr.bf16.mxu1 %v2932_v0 }
 0x3a8   :  { %2510 = vmatmul.mubr.msk.bf16.vlgmr.msra.gmra.mrb[8].mxu0 %vm243_vm3, %v267_v57 }
 0x3a9   :  { %2520 = vmatpush3.bf16.xpose.msra.mxu0 %v426_v58  ;;  %2521 = vmatprep.mubr.msk.bf16.mxu0 %vm2933_vm0, %v2932_v0 }
 0x3aa   :  { %2531 = vmatprep.subr.bf16.mxu0 %v2932_v0 }
 0x3ac   :  { %2516 = vmatmul.mubr.msk.bf16.vlgmr.msra.gmra.mrb[8].mxu1 %vm147_vm2, %v368_v59 }
 0x3ad   :  { %2527 = vmatprep.mubr.msk.bf16.mxu1 %vm2933_vm0, %v2932_v0 }
 0x3b0   :  { %2522 = vmatmul.mubr.msk.bf16.vlgmr.msra.gmra.mrb[12].mxu0 %vm147_vm2, %v419_v60 }
 0x3b1   :  { %2533 = vmatprep.mubr.msk.bf16.mxu0 %vm2933_vm0, %v2932_v0 }
 0x477   :  { %v3100_v61 = vpop.f32.mrb[4].mxu1 }
 0x478   :  { %v2505_v62 = vpop.f32.mrb[5].mxu1 }
 0x479   :  { %v314_v63 = vpop.f32.mrb[6].mxu1 }
 0x47a   :  { %v2506_v1 = vpop.f32.mrb[7].mxu1 }
 0x47b   :  { %v3102_v2 = vpop.f32.mrb[8].mxu0 }
 0x47c   :  { %v365_v3 = vpack.c.bf16 %v3102_v2, %v3100_v61  ;;  %v2511_v4 = vpop.f32.mrb[9].mxu0 }
 0x47d   :  { %v362_v5 = vpop.f32.mrb[10].mxu0 }
 0x47e   :  { %v2512_v6 = vpop.f32.mrb[11].mxu0 }
 0x47f   :  { %v411_v7 = vpop.f32.mrb[8].mxu1 }
 0x480   :  { %v2517_v8 = vpop.f32.mrb[9].mxu1  ;;  %v468_v9 = vsel %vm243_vm3, %v411_v7, -inf }
 0x481   :  { %469 = vmax.xlane.f32.xlu1 %v468_v9  ;;  %v414_v10 = vpop.f32.mrb[10].mxu1 }
 0x482   :  { %v2518_v12 = vpop.f32.mrb[11].mxu1 }
 0x483   :  { %v462_v13 = vpop.f32.mrb[12].mxu0 }
 0x484   :  { %v2523_v15 = vpop.f32.mrb[13].mxu0  ;;  %v471_v16 = vsel %vm243_vm3, %v462_v13, -inf }
 0x485   :  { %472 = vmax.xlane.f32.xlu0 %v471_v16  ;;  %v465_v17 = vpop.f32.mrb[14].mxu0 }
 0x486   :  { %v2524_v18 = vpop.f32.mrb[15].mxu0 }
 0x49b   :  { %540 = vrot.lane.b32.xlu0 %v3049_v14, %s2937_s9 }
 0x49f   :  { %688 = vrot.lane.b32.xlu0 %v3055_v20, %s2938_s10 }
 0x50e   :  { %v470_v19 = vpop.xlane.xlu1 %469 }
 0x50f   :  { %v474_v21 = vsub.f32 %v411_v7, %v470_v19 }
 0x511   :  { %v476_v23 = vmul.f32 1.442695, %v474_v21 }
 0x512   :  { %v473_v24 = vpop.xlane.xlu0 %472 }
 0x513   :  { %2775 = vpow2.f32 %v476_v23  ;;  %v475_v25 = vsub.f32 %v462_v13, %v473_v24 }
 0x515   :  { %v478_v26 = vmul.f32 1.442695, %v475_v25 }
 0x516   :  { %v541_v27 = vpop.permute.xlu0 %540 }
 0x517   :  { %2777 = vpow2.f32 %v478_v26  ;;  %v546_v28 = vsel %vm273_vm4, %v541_v27, 0 }
 0x518   :  { %2532 = vmatpush3.bf16.msra.mxu0 %v546_v28 }
 0x519   :  { %2543 = vmatprep.subr.bf16.mxu0 %v2932_v0 }
 0x51a   :  { %v689_v1 = vpop.permute.xlu0 %688 }
 0x51d   :  { %v2776_v29 = vpop.eup %2775 }
 0x51e   :  { %v480_v30 = vsel %vm243_vm3, %v2776_v29, 0.0 }
 0x51f   :  { %481 = vadd.xlane.f32.xlu1 %v480_v30 }
 0x521   :  { %v2778_v31 = vpop.eup %2777 }
 0x522   :  { %v483_v32 = vsel %vm243_vm3, %v2778_v31, 0.0 }
 0x523   :  { %484 = vadd.xlane.f32.xlu1 %v483_v32 }
 0x534   :  { %492 = vrot.lane.b32.xlu1 %v3046_v11, %s2937_s9 }
 0x538   :  { %690 = vrot.lane.b32.xlu1 %v3046_v11, %s2939_s11 }
 0x53c   :  { %740 = vrot.lane.b32.xlu1 %v3049_v14, %s2939_s11 }
 0x540   :  { %738 = vrot.lane.b32.xlu1 %v3062_v22, %s2938_s10 }
 0x5ac   :  { %v482_v33 = vpop.xlane.xlu1 %481 }
 0x5ad   :  { %2779 = vrcp.f32 %v482_v33 }
 0x5b0   :  { %v485_v34 = vpop.xlane.xlu1 %484 }
 0x5b1   :  { %2781 = vrcp.f32 %v485_v34 }
 0x5b4   :  { %v493_v37 = vpop.permute.xlu1 %492 }
 0x5b5   :  { %v498_v38 = vsel %vm273_vm4, %v493_v37, 0 }
 0x5b6   :  { %2526 = vmatpush3.bf16.msra.mxu1 %v498_v38 }
 0x5b7   :  { %v2780_v40 = vpop.eup %2779  ;;  %2537 = vmatprep.subr.bf16.mxu1 %v2932_v0 }
 0x5b8   :  { %v488_v41 = vmul.f32 %v2780_v40, %v2776_v29  ;;  %v691_v48 = vpop.permute.xlu1 %690 }
 0x5b9   :  { %v696_v60 = vsel %vm147_vm2, %v691_v48, 0 }
 0x5ba   :  { %v490_v42 = vpack.c.bf16 %v488_v41, %v488_v41 }
 0x5bb   :  { %v2782_v44 = vpop.eup %2781 }
 0x5bc   :  { %v489_v45 = vmul.f32 %v2782_v44, %v2778_v31  ;;  %2528 = vmatmul.mubr.msk.bf16.vlgmr.msra.gmra.mrb[12].mxu1 %vm243_vm3, %v490_v42  ;;  %v741_v49 = vpop.permute.xlu1 %740 }
 0x5bd   :  { %2538 = vmatpush3.bf16.msra.mxu1 %v598_v43  ;;  %2539 = vmatprep.mubr.msk.bf16.mxu1 %vm2933_vm0, %v2932_v0  ;;  %v746_v50 = vsel %vm147_vm2, %v741_v49, 0  ;;  %v3182_v49 = vld [vmem:[#allocation7 + $0x4] sm:$0xf] }
 0x5be   :  { %v491_v46 = vpack.c.bf16 %v489_v45, %v489_v45  ;;  %2549 = vmatprep.subr.bf16.mxu1 %v2932_v0 }
 0x5c0   :  { %2534 = vmatmul.mubr.msk.bf16.vlgmr.msra.gmra.mrb[16].mxu0 %vm243_vm3, %v491_v46  ;;  %v739_v51 = vpop.permute.xlu1 %738 }
 0x5c1   :  { %2544 = vmatpush3.bf16.msra.mxu0 %v645_v47  ;;  %2545 = vmatprep.mubr.msk.bf16.mxu0 %vm2933_vm0, %v2932_v0 }
 0x5c2   :  { %2555 = vmatprep.subr.bf16.mxu0 %v2932_v0 }
 0x5c8   :  { %2546 = vmatmul.mubr.msk.bf16.vlgmr.msra.gmra.mrb[20].mxu0 %vm147_vm2, %v365_v3 }
 0x5c9   :  { %2557 = vmatprep.mubr.msk.bf16.mxu0 %vm2933_vm0, %v2932_v0 }
 0x5ca   :  { %2556 = vmatpush3.bf16.xpose.msra.mxu0 %v746_v50  ;;  %v913_v50 = vsel %vm596_vm5, %v3182_v49, 0 }
 0x5cb   :  { %2567 = vmatprep.subr.bf16.mxu0 %v2932_v0 }
 0x5d1   :  { %2558 = vmatmul.mubr.msk.bf16.vlgmr.msra.gmra.mrb[24].mxu0 %vm147_vm2, %v739_v51 }
 0x5d2   :  { %2569 = vmatprep.mubr.msk.bf16.mxu0 %vm2933_vm0, %v2932_v0 }
 0x68f   :  { %v534_v52 = vpop.f32.mrb[12].mxu1 }
 0x690   :  { %v2529_v53 = vpop.f32.mrb[13].mxu1 }
 0x691   :  { %v537_v54 = vpop.f32.mrb[14].mxu1 }
 0x692   :  { %v2530_v55 = vpop.f32.mrb[15].mxu1 }
 0x693   :  { %v582_v56 = vpop.f32.mrb[16].mxu0 }
 0x694   :  { %v588_v57 = vpack.c.bf16 %v582_v56, %v534_v52  ;;  %v2535_v58 = vpop.f32.mrb[17].mxu0 }
 0x695   :  { %v585_v59 = vpop.f32.mrb[18].mxu0 }
 0x696   :  { %v2536_v61 = vpop.f32.mrb[19].mxu0  ;;  %2540 = vmatmul.mubr.msk.bf16.vlgmr.msra.gmra.mrb[16].mxu1 %vm147_vm2, %v588_v57 }
 0x697   :  { %2550 = vmatpush3.bf16.xpose.msra.mxu1 %v696_v60  ;;  %2551 = vmatprep.mubr.msk.bf16.mxu1 %vm2933_vm0, %v2932_v0 }
 0x698   :  { %2561 = vmatprep.subr.bf16.mxu1 %v2932_v0 }
 0x69b   :  { %v681_v62 = vpop.f32.mrb[20].mxu0 }
 0x69c   :  { %v2547_v63 = vpop.f32.mrb[21].mxu0 }
 0x69d   :  { %v684_v2 = vpop.f32.mrb[22].mxu0 }
 0x69e   :  { %v2548_v3 = vpop.f32.mrb[23].mxu0  ;;  %2552 = vmatmul.mubr.msk.bf16.vlgmr.msra.gmra.mrb[20].mxu1 %vm147_vm2, %v689_v1 }
 0x69f   :  { %2563 = vmatprep.mubr.msk.bf16.mxu1 %vm2933_vm0, %v2932_v0 }
 0x6a4   :  { %v782_v4 = vpop.f32.mrb[24].mxu0 }
 0x6a5   :  { %v2559_v5 = vpop.f32.mrb[25].mxu0  ;;  %v791_v6 = vsel %vm243_vm3, %v782_v4, -inf }
 0x6a6   :  { %792 = vmax.xlane.f32.xlu1 %v791_v6  ;;  %v785_v7 = vpop.f32.mrb[26].mxu0 }
 0x6a7   :  { %v2560_v8 = vpop.f32.mrb[27].mxu0 }
 0x6b7   :  { %812 = vrot.lane.b32.xlu1 %v3046_v11, %s2940_s12 }
 0x6bb   :  { %960 = vrot.lane.b32.xlu1 %v3046_v11, %s2941_s13 }
 0x6bf   :  { %1010 = vrot.lane.b32.xlu1 %v3049_v14, %s2941_s13 }
 0x6c3   :  { %1008 = vrot.lane.b32.xlu1 %v3062_v22, %s2942_s14 }
 0x733   :  { %v793_v9 = vpop.xlane.xlu1 %792 }
 0x734   :  { %v795_v13 = vsub.f32 %v782_v4, %v793_v9 }
 0x736   :  { %v798_v15 = vmul.f32 1.442695, %v795_v13 }
 0x737   :  { %v813_v10 = vpop.permute.xlu1 %812 }
 0x738   :  { %v818_v12 = vsel %vm273_vm4, %v813_v10, 0  ;;  %2783 = vpow2.f32 %v798_v15 }
 0x739   :  { %2562 = vmatpush3.bf16.msra.mxu1 %v818_v12 }
 0x73a   :  { %2573 = vmatprep.subr.bf16.mxu1 %v2932_v0 }
 0x73b   :  { %v961_v44 = vpop.permute.xlu1 %960 }
 0x73c   :  { %v966_v46 = vsel %vm147_vm2, %v961_v44, 0 }
 0x73f   :  { %v1011_v55 = vpop.permute.xlu1 %1010 }
 0x740   :  { %v1016_v60 = vsel %vm147_vm2, %v1011_v55, 0 }
 0x742   :  { %v2784_v27 = vpop.eup %2783 }
 0x743   :  { %v803_v30 = vsel %vm243_vm3, %v2784_v27, 0.0  ;;  %v1009_v4 = vpop.permute.xlu1 %1008 }
 0x769   :  { %v634_v16 = vpop.f32.mrb[16].mxu1 }
 0x76a   :  { %v3158_v17 = vadd.f32 %v681_v62, %v634_v16  ;;  %v2541_v18 = vpop.f32.mrb[17].mxu1 }
 0x76b   :  { %v637_v19 = vpop.f32.mrb[18].mxu1 }
 0x76c   :  { %v3160_v21 = vadd.f32 %v684_v2, %v637_v19  ;;  %v2542_v23 = vpop.f32.mrb[19].mxu1 }
 0x771   :  { %v732_v24 = vpop.f32.mrb[20].mxu1 }
 0x772   :  { %v2553_v25 = vpop.f32.mrb[21].mxu1  ;;  %v788_v26 = vsel %vm243_vm3, %v732_v24, -inf }
 0x773   :  { %789 = vmax.xlane.f32.xlu0 %v788_v26  ;;  %v735_v28 = vpop.f32.mrb[22].mxu1 }
 0x774   :  { %v2554_v29 = vpop.f32.mrb[23].mxu1 }
 0x777   :  { %804 = vadd.xlane.f32.xlu0 %v803_v30 }
 0x800   :  { %v790_v31 = vpop.xlane.xlu0 %789 }
 0x801   :  { %v794_v32 = vsub.f32 %v732_v24, %v790_v31 }
 0x803   :  { %v796_v33 = vmul.f32 1.442695, %v794_v32 }
 0x804   :  { %v805_v36 = vpop.xlane.xlu0 %804 }
 0x805   :  { %2785 = vpow2.f32 %v796_v33 }
 0x806   :  { %2787 = vrcp.f32 %v805_v36  ;;  %v2373_v36 = vcombine.low %v3182_v49, %v3182_v49 }
 0x80f   :  { %v2786_v34 = vpop.eup %2785 }
 0x810   :  { %v800_v35 = vsel %vm243_vm3, %v2786_v34, 0.0  ;;  %v2788_v37 = vpop.eup %2787 }
 0x811   :  { %801 = vadd.xlane.f32.xlu0 %v800_v35  ;;  %v809_v39 = vmul.f32 %v2788_v37, %v2784_v27  ;;  %v1182_v37 = vrot.slane %v2373_v36, 2 }
 0x813   :  { %v811_v42 = vpack.c.bf16 %v809_v39, %v809_v39 }
 0x827   :  { %860 = vrot.lane.b32.xlu0 %v3049_v14, %s2940_s12 }
 0x82b   :  { %958 = vrot.lane.b32.xlu0 %v3055_v20, %s2942_s14 }
 0x89e   :  { %v802_v38 = vpop.xlane.xlu0 %801 }
 0x89f   :  { %2789 = vrcp.f32 %v802_v38  ;;  %v1187_v38 = vsel %vm596_vm5, %v1182_v37, 0 }
 0x8a2   :  { %v861_v40 = vpop.permute.xlu0 %860 }
 0x8a3   :  { %v866_v41 = vsel %vm273_vm4, %v861_v40, 0 }
 0x8a4   :  { %2568 = vmatpush3.bf16.msra.mxu0 %v866_v41 }
 0x8a5   :  { %2579 = vmatprep.subr.bf16.mxu0 %v2932_v0 }
 0x8a6   :  { %v959_v48 = vpop.permute.xlu0 %958 }
 0x8a7   :  { %2570 = vmatmul.mubr.msk.bf16.vlgmr.msra.gmra.mrb[28].mxu0 %vm243_vm3, %v811_v42 }
 0x8a8   :  { %2581 = vmatprep.mubr.msk.bf16.mxu0 %vm2933_vm0, %v2932_v0 }
 0x8a9   :  { %v2790_v43 = vpop.eup %2789 }
 0x8aa   :  { %v808_v45 = vmul.f32 %v2790_v43, %v2786_v34 }
 0x8ac   :  { %v810_v47 = vpack.c.bf16 %v808_v45, %v808_v45 }
 0x8ad   :  { %2580 = vmatpush3.bf16.xpose.msra.mxu0 %v966_v46 }
 0x8ae   :  { %2564 = vmatmul.mubr.msk.bf16.vlgmr.msra.gmra.mrb[24].mxu1 %vm243_vm3, %v810_v47  ;;  %2591 = vmatprep.subr.bf16.mxu0 %v2932_v0 }
 0x8af   :  { %2575 = vmatprep.mubr.msk.bf16.mxu1 %vm2933_vm0, %v2932_v0  ;;  %2574 = vmatpush3.bf16.msra.mxu1 %v913_v50 }
 0x8b0   :  { %2585 = vmatprep.subr.bf16.mxu1 %v2932_v0 }
 0x8b4   :  { %2582 = vmatmul.mubr.msk.bf16.vlgmr.msra.gmra.mrb[32].mxu0 %vm147_vm2, %v959_v48 }
 0x8b5   :  { %2593 = vmatprep.mubr.msk.bf16.mxu0 %vm2933_vm0, %v2932_v0 }
 0x97a   :  { %v902_v51 = vpop.f32.mrb[28].mxu0 }
 0x97b   :  { %v2571_v52 = vpop.f32.mrb[29].mxu0 }
 0x97c   :  { %v905_v53 = vpop.f32.mrb[30].mxu0 }
 0x97d   :  { %v2572_v54 = vpop.f32.mrb[31].mxu0 }
 0x981   :  { %v854_v56 = vpop.f32.mrb[24].mxu1 }
 0x982   :  { %v908_v57 = vpack.c.bf16 %v902_v51, %v854_v56  ;;  %v2565_v58 = vpop.f32.mrb[25].mxu1 }
 0x983   :  { %v857_v59 = vpop.f32.mrb[26].mxu1 }
 0x984   :  { %v2566_v61 = vpop.f32.mrb[27].mxu1  ;;  %2576 = vmatmul.mubr.msk.bf16.vlgmr.msra.gmra.mrb[28].mxu1 %vm147_vm2, %v908_v57 }
 0x985   :  { %2586 = vmatpush3.bf16.xpose.msra.mxu1 %v1016_v60  ;;  %2587 = vmatprep.mubr.msk.bf16.mxu1 %vm2933_vm0, %v2932_v0 }
 0x986   :  { %2597 = vmatprep.subr.bf16.mxu1 %v2932_v0 }
 0x987   :  { %v1002_v62 = vpop.f32.mrb[32].mxu0 }
 0x988   :  { %v2583_v63 = vpop.f32.mrb[33].mxu0  ;;  %v1058_v1 = vsel %vm243_vm3, %v1002_v62, -inf }
 0x989   :  { %1059 = vmax.xlane.f32.xlu0 %v1058_v1  ;;  %v1005_v2 = vpop.f32.mrb[34].mxu0 }
 0x98a   :  { %v2584_v3 = vpop.f32.mrb[35].mxu0 }
 0x98c   :  { %2588 = vmatmul.mubr.msk.bf16.vlgmr.msra.gmra.mrb[32].mxu1 %vm147_vm2, %v1009_v4 }
 0x98d   :  { %2599 = vmatprep.mubr.msk.bf16.mxu1 %vm2933_vm0, %v2932_v0 }
 0xa16   :  { %v1060_v5 = vpop.xlane.xlu0 %1059 }
 0xa17   :  { %v1064_v6 = vsub.f32 %v1002_v62, %v1060_v5 }
 0xa19   :  { %v1066_v7 = vmul.f32 1.442695, %v1064_v6 }
 0xa1b   :  { %2791 = vpow2.f32 %v1066_v7 }
 0xa25   :  { %v2792_v8 = vpop.eup %2791 }
 0xa26   :  { %v1070_v9 = vsel %vm243_vm3, %v2792_v8, 0.0 }
 0xa27   :  { %1071 = vadd.xlane.f32.xlu0 %v1070_v9 }
 0xa57   :  { %v949_v10 = vpop.f32.mrb[28].mxu1 }
 0xa58   :  { %v3198_v12 = vadd.f32 %v949_v10, %v3158_v17  ;;  %v2577_v13 = vpop.f32.mrb[29].mxu1 }
 0xa59   :  { %v952_v15 = vpop.f32.mrb[30].mxu1 }
 0xa5a   :  { %v3201_v16 = vadd.f32 %v952_v15, %v3160_v21  ;;  %v2578_v18 = vpop.f32.mrb[31].mxu1 }
 0xa5f   :  { %v1052_v19 = vpop.f32.mrb[32].mxu1 }
 0xa60   :  { %v2589_v23 = vpop.f32.mrb[33].mxu1  ;;  %v1061_v24 = vsel %vm243_vm3, %v1052_v19, -inf }
 0xa61   :  { %1062 = vmax.xlane.f32.xlu1 %v1061_v24  ;;  %v1055_v25 = vpop.f32.mrb[34].mxu1 }
 0xa62   :  { %v2590_v26 = vpop.f32.mrb[35].mxu1 }
 0xa72   :  { %1082 = vrot.lane.b32.xlu1 %v3046_v11, %s2943_s15 }
 0xa76   :  { %1234 = vrot.lane.b32.xlu1 %v3046_v11, %s2944_s16 }
 0xa7a   :  { %1284 = vrot.lane.b32.xlu1 %v3049_v14, %s2944_s16 }
 0xa7e   :  { %1282 = vrot.lane.b32.xlu1 %v3062_v22, %s2945_s18 }
 0xab4   :  { %v1072_v17 = vpop.xlane.xlu0 %1071 }
 0xab5   :  { %2793 = vrcp.f32 %v1072_v17 }
 0xabf   :  { %v2794_v21 = vpop.eup %2793 }
 0xac0   :  { %v1078_v29 = vmul.f32 %v2794_v21, %v2792_v8 }
 0xac2   :  { %v1080_v33 = vpack.c.bf16 %v1078_v29, %v1078_v29 }
 0xaee   :  { %v1063_v27 = vpop.xlane.xlu1 %1062 }
 0xaef   :  { %v1065_v28 = vsub.f32 %v1052_v19, %v1063_v27 }
 0xaf1   :  { %v1068_v30 = vmul.f32 1.442695, %v1065_v28 }
 0xaf2   :  { %v1083_v31 = vpop.permute.xlu1 %1082 }
 0xaf3   :  { %2795 = vpow2.f32 %v1068_v30  ;;  %v1088_v32 = vsel %vm273_vm4, %v1083_v31, 0 }
 0xaf4   :  { %2592 = vmatpush3.bf16.msra.mxu0 %v1088_v32 }
 0xaf5   :  { %2603 = vmatprep.subr.bf16.mxu0 %v2932_v0 }
 0xaf6   :  { %v1235_v44 = vpop.permute.xlu1 %1234 }
 0xaf7   :  { %2594 = vmatmul.mubr.msk.bf16.vlgmr.msra.gmra.mrb[36].mxu0 %vm243_vm3, %v1080_v33  ;;  %v1240_v46 = vsel %vm147_vm2, %v1235_v44, 0  ;;  %v3259_v33 = vld [vmem:[#allocation7 + $0x8] sm:$0xf] }
 0xaf8   :  { %2605 = vmatprep.mubr.msk.bf16.mxu0 %vm2933_vm0, %v2932_v0  ;;  %2604 = vmatpush3.bf16.msra.mxu0 %v1187_v38 }
 0xaf9   :  { %2615 = vmatprep.subr.bf16.mxu0 %v2932_v0 }
 0xafa   :  { %v1285_v52 = vpop.permute.xlu1 %1284 }
 0xafb   :  { %v1290_v57 = vsel %vm147_vm2, %v1285_v52, 0 }
 0xafd   :  { %v2796_v34 = vpop.eup %2795 }
 0xafe   :  { %v1073_v35 = vsel %vm243_vm3, %v2796_v34, 0.0  ;;  %v1283_v62 = vpop.permute.xlu1 %1282 }
 0xaff   :  { %1074 = vadd.xlane.f32.xlu0 %v1073_v35 }
 0xb15   :  { %1130 = vrot.lane.b32.xlu0 %v3049_v14, %s2943_s15 }
 0xb19   :  { %1232 = vrot.lane.b32.xlu0 %v3055_v20, %s2945_s18 }
 0xb8c   :  { %v1075_v39 = vpop.xlane.xlu0 %1074 }
 0xb8d   :  { %2797 = vrcp.f32 %v1075_v39 }
 0xb90   :  { %v1131_v40 = vpop.permute.xlu0 %1130 }
 0xb91   :  { %v1136_v41 = vsel %vm273_vm4, %v1131_v40, 0 }
 0xb92   :  { %2598 = vmatpush3.bf16.msra.mxu1 %v1136_v41 }
 0xb93   :  { %2609 = vmatprep.subr.bf16.mxu1 %v2932_v0 }
 0xb94   :  { %v1233_v47 = vpop.permute.xlu0 %1232 }
 0xb97   :  { %v2798_v42 = vpop.eup %2797 }
 0xb98   :  { %v1079_v43 = vmul.f32 %v2798_v42, %v2796_v34  ;;  %v1457_v34 = vsel %vm596_vm5, %v3259_v33, 0 }
 0xb9a   :  { %v1081_v45 = vpack.c.bf16 %v1079_v43, %v1079_v43 }
 0xb9c   :  { %2600 = vmatmul.mubr.msk.bf16.vlgmr.msra.gmra.mrb[36].mxu1 %vm243_vm3, %v1081_v45 }
 0xb9d   :  { %2610 = vmatpush3.bf16.xpose.msra.mxu1 %v1240_v46  ;;  %2611 = vmatprep.mubr.msk.bf16.mxu1 %vm2933_vm0, %v2932_v0 }
 0xb9e   :  { %2621 = vmatprep.subr.bf16.mxu1 %v2932_v0 }
 0xba4   :  { %2612 = vmatmul.mubr.msk.bf16.vlgmr.msra.gmra.mrb[40].mxu1 %vm147_vm2, %v1233_v47 }
 0xba5   :  { %2623 = vmatprep.mubr.msk.bf16.mxu1 %vm2933_vm0, %v2932_v0 }
 0xbca   :  { %v1124_v48 = vpop.f32.mrb[36].mxu0 }
 0xbcb   :  { %v2595_v49 = vpop.f32.mrb[37].mxu0 }
 0xbcc   :  { %v1127_v50 = vpop.f32.mrb[38].mxu0 }
 0xbcd   :  { %v2596_v51 = vpop.f32.mrb[39].mxu0 }
 0xc6f   :  { %v1172_v53 = vpop.f32.mrb[36].mxu1 }
 0xc70   :  { %v1178_v54 = vpack.c.bf16 %v1172_v53, %v1124_v48  ;;  %v2601_v55 = vpop.f32.mrb[37].mxu1 }
 0xc71   :  { %v1175_v56 = vpop.f32.mrb[38].mxu1 }
 0xc72   :  { %v2602_v58 = vpop.f32.mrb[39].mxu1  ;;  %2606 = vmatmul.mubr.msk.bf16.vlgmr.msra.gmra.mrb[40].mxu0 %vm147_vm2, %v1178_v54 }
 0xc73   :  { %2616 = vmatpush3.bf16.xpose.msra.mxu0 %v1290_v57  ;;  %2617 = vmatprep.mubr.msk.bf16.mxu0 %vm2933_vm0, %v2932_v0 }
 0xc74   :  { %2627 = vmatprep.subr.bf16.mxu0 %v2932_v0 }
 0xc77   :  { %v1276_v59 = vpop.f32.mrb[40].mxu1 }
 0xc78   :  { %v2613_v60 = vpop.f32.mrb[41].mxu1  ;;  %v1332_v61 = vsel %vm243_vm3, %v1276_v59, -inf }
 0xc79   :  { %1333 = vmax.xlane.f32.xlu0 %v1332_v61  ;;  %v1279_v63 = vpop.f32.mrb[42].mxu1 }
 0xc7a   :  { %v2614_v1 = vpop.f32.mrb[43].mxu1  ;;  %2618 = vmatmul.mubr.msk.bf16.vlgmr.msra.gmra.mrb[44].mxu0 %vm147_vm2, %v1283_v62 }
 0xc7b   :  { %2629 = vmatprep.mubr.msk.bf16.mxu0 %vm2933_vm0, %v2932_v0 }
 0xd06   :  { %v1334_v2 = vpop.xlane.xlu0 %1333 }
 0xd07   :  { %v1338_v3 = vsub.f32 %v1276_v59, %v1334_v2 }
 0xd09   :  { %v1340_v4 = vmul.f32 1.442695, %v1338_v3 }
 0xd0b   :  { %2799 = vpow2.f32 %v1340_v4 }
 0xd15   :  { %v2800_v5 = vpop.eup %2799 }
 0xd16   :  { %v1344_v6 = vsel %vm243_vm3, %v2800_v5, 0.0 }
 0xd17   :  { %1345 = vadd.xlane.f32.xlu0 %v1344_v6 }
 0xd45   :  { %v1223_v7 = vpop.f32.mrb[40].mxu0 }
 0xd46   :  { %v3241_v8 = vadd.f32 %v1223_v7, %v3198_v12  ;;  %v2607_v9 = vpop.f32.mrb[41].mxu0 }
 0xd47   :  { %v1226_v10 = vpop.f32.mrb[42].mxu0 }
 0xd48   :  { %v3244_v13 = vadd.f32 %v1226_v10, %v3201_v16  ;;  %v2608_v15 = vpop.f32.mrb[43].mxu0 }
 0xd4d   :  { %v1326_v18 = vpop.f32.mrb[44].mxu0 }
 0xd4e   :  { %v2619_v19 = vpop.f32.mrb[45].mxu0  ;;  %v1335_v23 = vsel %vm243_vm3, %v1326_v18, -inf }
 0xd4f   :  { %1336 = vmax.xlane.f32.xlu1 %v1335_v23  ;;  %v1329_v24 = vpop.f32.mrb[46].mxu0 }
 0xd50   :  { %v2620_v25 = vpop.f32.mrb[47].mxu0 }
 0xd60   :  { %1356 = vrot.lane.b32.xlu1 %v3046_v11, %s2946_s19 }
 0xd64   :  { %1504 = vrot.lane.b32.xlu1 %v3046_v11, %s2947_s20 }
 0xd68   :  { %1554 = vrot.lane.b32.xlu1 %v3049_v14, %s2947_s20 }
 0xd6c   :  { %1552 = vrot.lane.b32.xlu1 %v3062_v22, %s2948_s21 }
 0xda4   :  { %v1346_v12 = vpop.xlane.xlu0 %1345 }
 0xda5   :  { %2801 = vrcp.f32 %v1346_v12 }
 0xdaf   :  { %v2802_v16 = vpop.eup %2801 }
 0xdb0   :  { %v1352_v21 = vmul.f32 %v2802_v16, %v2800_v5 }
 0xdb2   :  { %v1354_v30 = vpack.c.bf16 %v1352_v21, %v1352_v21 }
 0xddc   :  { %v1337_v26 = vpop.xlane.xlu1 %1336 }
 0xddd   :  { %v1339_v17 = vsub.f32 %v1326_v18, %v1337_v26 }
 0xddf   :  { %v1342_v27 = vmul.f32 1.442695, %v1339_v17 }
 0xde0   :  { %v1357_v28 = vpop.permute.xlu1 %1356 }
 0xde1   :  { %2803 = vpow2.f32 %v1342_v27  ;;  %v1362_v29 = vsel %vm273_vm4, %v1357_v28, 0 }
 0xde2   :  { %2622 = vmatpush3.bf16.msra.mxu1 %v1362_v29  ;;  %v2384_v29 = vcombine.low %v3259_v33, %v3259_v33 }
 0xde3   :  { %2633 = vmatprep.subr.bf16.mxu1 %v2932_v0 }
 0xde4   :  { %v1505_v40 = vpop.permute.xlu1 %1504 }
 0xde5   :  { %2624 = vmatmul.mubr.msk.bf16.vlgmr.msra.gmra.mrb[44].mxu1 %vm243_vm3, %v1354_v30  ;;  %v1510_v42 = vsel %vm147_vm2, %v1505_v40, 0  ;;  %v1726_v30 = vrot.slane %v2384_v29, 2 }
 0xde6   :  { %2635 = vmatprep.mubr.msk.bf16.mxu1 %vm2933_vm0, %v2932_v0  ;;  %2634 = vmatpush3.bf16.msra.mxu1 %v1457_v34 }
 0xde7   :  { %2645 = vmatprep.subr.bf16.mxu1 %v2932_v0 }
 0xde8   :  { %v1555_v48 = vpop.permute.xlu1 %1554 }
 0xde9   :  { %v1560_v53 = vsel %vm147_vm2, %v1555_v48, 0 }
 0xdeb   :  { %v2804_v31 = vpop.eup %2803 }
 0xdec   :  { %v1347_v32 = vsel %vm243_vm3, %v2804_v31, 0.0  ;;  %v1553_v58 = vpop.permute.xlu1 %1552 }
 0xded   :  { %1348 = vadd.xlane.f32.xlu0 %v1347_v32 }
 0xe03   :  { %1404 = vrot.lane.b32.xlu0 %v3049_v14, %s2946_s19 }
 0xe07   :  { %1502 = vrot.lane.b32.xlu0 %v3055_v20, %s2948_s21 }
 0xe7a   :  { %v1349_v35 = vpop.xlane.xlu0 %1348 }
 0xe7b   :  { %2805 = vrcp.f32 %v1349_v35 }
 0xe7e   :  { %v1405_v36 = vpop.permute.xlu0 %1404 }
 0xe7f   :  { %v1410_v37 = vsel %vm273_vm4, %v1405_v36, 0 }
 0xe80   :  { %2628 = vmatpush3.bf16.msra.mxu0 %v1410_v37 }
 0xe81   :  { %2639 = vmatprep.subr.bf16.mxu0 %v2932_v0 }
 0xe82   :  { %v1503_v43 = vpop.permute.xlu0 %1502 }
 0xe85   :  { %v2806_v38 = vpop.eup %2805 }
 0xe86   :  { %v1353_v39 = vmul.f32 %v2806_v38, %v2804_v31  ;;  %v1731_v31 = vsel %vm596_vm5, %v1726_v30, 0 }
 0xe88   :  { %v1355_v41 = vpack.c.bf16 %v1353_v39, %v1353_v39 }
 0xe8a   :  { %2630 = vmatmul.mubr.msk.bf16.vlgmr.msra.gmra.mrb[48].mxu0 %vm243_vm3, %v1355_v41 }
 0xe8b   :  { %2640 = vmatpush3.bf16.xpose.msra.mxu0 %v1510_v42  ;;  %2641 = vmatprep.mubr.msk.bf16.mxu0 %vm2933_vm0, %v2932_v0 }
 0xe8c   :  { %2651 = vmatprep.subr.bf16.mxu0 %v2932_v0 }
 0xe92   :  { %2642 = vmatmul.mubr.msk.bf16.vlgmr.msra.gmra.mrb[52].mxu0 %vm147_vm2, %v1503_v43 }
 0xe93   :  { %2653 = vmatprep.mubr.msk.bf16.mxu0 %vm2933_vm0, %v2932_v0 }
 0xeb8   :  { %v1398_v44 = vpop.f32.mrb[44].mxu1 }
 0xeb9   :  { %v2625_v45 = vpop.f32.mrb[45].mxu1 }
 0xeba   :  { %v1401_v46 = vpop.f32.mrb[46].mxu1 }
 0xebb   :  { %v2626_v47 = vpop.f32.mrb[47].mxu1 }
 0xf5d   :  { %v1446_v49 = vpop.f32.mrb[48].mxu0 }
 0xf5e   :  { %v1452_v50 = vpack.c.bf16 %v1446_v49, %v1398_v44  ;;  %v2631_v51 = vpop.f32.mrb[49].mxu0 }
 0xf5f   :  { %v1449_v52 = vpop.f32.mrb[50].mxu0 }
 0xf60   :  { %v2632_v54 = vpop.f32.mrb[51].mxu0  ;;  %2636 = vmatmul.mubr.msk.bf16.vlgmr.msra.gmra.mrb[48].mxu1 %vm147_vm2, %v1452_v50 }
 0xf61   :  { %2646 = vmatpush3.bf16.xpose.msra.mxu1 %v1560_v53  ;;  %2647 = vmatprep.mubr.msk.bf16.mxu1 %vm2933_vm0, %v2932_v0 }
 0xf62   :  { %2657 = vmatprep.subr.bf16.mxu1 %v2932_v0 }
 0xf65   :  { %v1546_v55 = vpop.f32.mrb[52].mxu0 }
 0xf66   :  { %v2643_v56 = vpop.f32.mrb[53].mxu0  ;;  %v1602_v57 = vsel %vm243_vm3, %v1546_v55, -inf }
 0xf67   :  { %1603 = vmax.xlane.f32.xlu0 %v1602_v57  ;;  %v1549_v59 = vpop.f32.mrb[54].mxu0 }
 0xf68   :  { %v2644_v60 = vpop.f32.mrb[55].mxu0  ;;  %2648 = vmatmul.mubr.msk.bf16.vlgmr.msra.gmra.mrb[52].mxu1 %vm147_vm2, %v1553_v58 }
 0xf69   :  { %2659 = vmatprep.mubr.msk.bf16.mxu1 %vm2933_vm0, %v2932_v0 }
 0xff4   :  { %v1604_v61 = vpop.xlane.xlu0 %1603 }
 0xff5   :  { %v1608_v62 = vsub.f32 %v1546_v55, %v1604_v61 }
 0xff7   :  { %v1610_v63 = vmul.f32 1.442695, %v1608_v62 }
 0xff9   :  { %2807 = vpow2.f32 %v1610_v63 }
0x1003   :  { %v2808_v1 = vpop.eup %2807 }
0x1004   :  { %v1614_v2 = vsel %vm243_vm3, %v2808_v1, 0.0 }
0x1005   :  { %1615 = vadd.xlane.f32.xlu0 %v1614_v2 }
0x1033   :  { %v1493_v3 = vpop.f32.mrb[48].mxu1 }
0x1034   :  { %v3285_v4 = vadd.f32 %v1493_v3, %v3241_v8  ;;  %v2637_v5 = vpop.f32.mrb[49].mxu1 }
0x1035   :  { %v1496_v6 = vpop.f32.mrb[50].mxu1 }
0x1036   :  { %v3288_v7 = vadd.f32 %v1496_v6, %v3244_v13  ;;  %v2638_v9 = vpop.f32.mrb[51].mxu1 }
0x103b   :  { %v1596_v10 = vpop.f32.mrb[52].mxu1 }
0x103c   :  { %v2649_v15 = vpop.f32.mrb[53].mxu1  ;;  %v1605_v18 = vsel %vm243_vm3, %v1596_v10, -inf }
0x103d   :  { %1606 = vmax.xlane.f32.xlu1 %v1605_v18  ;;  %v1599_v19 = vpop.f32.mrb[54].mxu1 }
0x103e   :  { %v2650_v23 = vpop.f32.mrb[55].mxu1 }
0x104e   :  { %1626 = vrot.lane.b32.xlu1 %v3046_v11, %s2949_s22 }
0x1052   :  { %1778 = vrot.lane.b32.xlu1 %v3046_v11, %s2950_s23 }
0x1056   :  { %1828 = vrot.lane.b32.xlu1 %v3049_v14, %s2950_s23 }
0x105a   :  { %1826 = vrot.lane.b32.xlu1 %v3062_v22, %s2951_s24 }
0x1092   :  { %v1616_v8 = vpop.xlane.xlu0 %1615 }
0x1093   :  { %2809 = vrcp.f32 %v1616_v8 }
0x109d   :  { %v2810_v13 = vpop.eup %2809 }
0x109e   :  { %v1622_v12 = vmul.f32 %v2810_v13, %v2808_v1 }
0x10a0   :  { %v1624_v21 = vpack.c.bf16 %v1622_v12, %v1622_v12 }
0x10ca   :  { %v1607_v24 = vpop.xlane.xlu1 %1606 }
0x10cb   :  { %v1609_v25 = vsub.f32 %v1596_v10, %v1607_v24 }
0x10cd   :  { %v1612_v16 = vmul.f32 1.442695, %v1609_v25 }
0x10ce   :  { %v1627_v26 = vpop.permute.xlu1 %1626 }
0x10cf   :  { %2811 = vpow2.f32 %v1612_v16  ;;  %v1632_v17 = vsel %vm273_vm4, %v1627_v26, 0 }
0x10d0   :  { %2652 = vmatpush3.bf16.msra.mxu0 %v1632_v17  ;;  %v3346_v17 = vld [vmem:[#allocation7 + $0xc] sm:$0xf] }
0x10d1   :  { %2663 = vmatprep.subr.bf16.mxu0 %v2932_v0 }
0x10d2   :  { %v1779_v38 = vpop.permute.xlu1 %1778 }
0x10d3   :  { %2654 = vmatmul.mubr.msk.bf16.vlgmr.msra.gmra.mrb[56].mxu0 %vm243_vm3, %v1624_v21  ;;  %v1784_v33 = vsel %vm147_vm2, %v1779_v38, 0  ;;  %v2001_v21 = vsel %vm596_vm5, %v3346_v17, 0 }
0x10d4   :  { %2665 = vmatprep.mubr.msk.bf16.mxu0 %vm2933_vm0, %v2932_v0  ;;  %2664 = vmatpush3.bf16.msra.mxu0 %v1731_v31 }
0x10d5   :  { %2675 = vmatprep.subr.bf16.mxu0 %v2932_v0 }
0x10d6   :  { %v1829_v45 = vpop.permute.xlu1 %1828 }
0x10d7   :  { %v1834_v50 = vsel %vm147_vm2, %v1829_v45, 0 }
0x10d9   :  { %v2812_v27 = vpop.eup %2811 }
0x10da   :  { %v1617_v28 = vsel %vm243_vm3, %v2812_v27, 0.0  ;;  %v1827_v55 = vpop.permute.xlu1 %1826 }
0x10db   :  { %1618 = vadd.xlane.f32.xlu0 %v1617_v28 }
0x10f1   :  { %1674 = vrot.lane.b32.xlu0 %v3049_v14, %s2949_s22 }
0x10f5   :  { %1776 = vrot.lane.b32.xlu0 %v3055_v20, %s2951_s24 }
0x1168   :  { %v1619_v32 = vpop.xlane.xlu0 %1618 }
0x1169   :  { %2813 = vrcp.f32 %v1619_v32 }
0x116c   :  { %v1675_v34 = vpop.permute.xlu0 %1674 }
0x116d   :  { %v1680_v35 = vsel %vm273_vm4, %v1675_v34, 0 }
0x116e   :  { %2658 = vmatpush3.bf16.msra.mxu1 %v1680_v35 }
0x116f   :  { %2669 = vmatprep.subr.bf16.mxu1 %v2932_v0 }
0x1170   :  { %v1777_v40 = vpop.permute.xlu0 %1776 }
0x1173   :  { %v2814_v36 = vpop.eup %2813 }
0x1174   :  { %v1623_v37 = vmul.f32 %v2814_v36, %v2812_v27 }
0x1176   :  { %v1625_v39 = vpack.c.bf16 %v1623_v37, %v1623_v37 }
0x1178   :  { %2660 = vmatmul.mubr.msk.bf16.vlgmr.msra.gmra.mrb[56].mxu1 %vm243_vm3, %v1625_v39 }
0x1179   :  { %2670 = vmatpush3.bf16.xpose.msra.mxu1 %v1784_v33  ;;  %2671 = vmatprep.mubr.msk.bf16.mxu1 %vm2933_vm0, %v2932_v0 }
0x117a   :  { %2681 = vmatprep.subr.bf16.mxu1 %v2932_v0 }
0x1180   :  { %2672 = vmatmul.mubr.msk.bf16.vlgmr.msra.gmra.mrb[60].mxu1 %vm147_vm2, %v1777_v40 }
0x1181   :  { %2683 = vmatprep.mubr.msk.bf16.mxu1 %vm2933_vm0, %v2932_v0 }
0x11a6   :  { %v1668_v41 = vpop.f32.mrb[56].mxu0 }
0x11a7   :  { %v2655_v42 = vpop.f32.mrb[57].mxu0 }
0x11a8   :  { %v1671_v43 = vpop.f32.mrb[58].mxu0 }
0x11a9   :  { %v2656_v44 = vpop.f32.mrb[59].mxu0 }
0x124b   :  { %v1716_v46 = vpop.f32.mrb[56].mxu1 }
0x124c   :  { %v1722_v47 = vpack.c.bf16 %v1716_v46, %v1668_v41  ;;  %v2661_v48 = vpop.f32.mrb[57].mxu1 }
0x124d   :  { %v1719_v49 = vpop.f32.mrb[58].mxu1 }
0x124e   :  { %v2662_v51 = vpop.f32.mrb[59].mxu1  ;;  %2666 = vmatmul.mubr.msk.bf16.vlgmr.msra.gmra.mrb[60].mxu0 %vm147_vm2, %v1722_v47 }
0x124f   :  { %2676 = vmatpush3.bf16.xpose.msra.mxu0 %v1834_v50  ;;  %2677 = vmatprep.mubr.msk.bf16.mxu0 %vm2933_vm0, %v2932_v0 }
0x1250   :  { %2687 = vmatprep.subr.bf16.mxu0 %v2932_v0 }
0x1253   :  { %v1820_v52 = vpop.f32.mrb[60].mxu1 }
0x1254   :  { %v2673_v53 = vpop.f32.mrb[61].mxu1  ;;  %v1876_v54 = vsel %vm243_vm3, %v1820_v52, -inf }
0x1255   :  { %1877 = vmax.xlane.f32.xlu0 %v1876_v54  ;;  %v1823_v56 = vpop.f32.mrb[62].mxu1 }
0x1256   :  { %v2674_v57 = vpop.f32.mrb[63].mxu1  ;;  %2678 = vmatmul.mubr.msk.bf16.vlgmr.msra.gmra.mrb[64].mxu0 %vm147_vm2, %v1827_v55 }
0x1257   :  { %2689 = vmatprep.mubr.msk.bf16.mxu0 %vm2933_vm0, %v2932_v0 }
0x12e2   :  { %v1878_v58 = vpop.xlane.xlu0 %1877 }
0x12e3   :  { %v1882_v59 = vsub.f32 %v1820_v52, %v1878_v58 }
0x12e5   :  { %v1884_v60 = vmul.f32 1.442695, %v1882_v59 }
0x12e7   :  { %2815 = vpow2.f32 %v1884_v60 }
0x12f1   :  { %v2816_v61 = vpop.eup %2815 }
0x12f2   :  { %v1888_v62 = vsel %vm243_vm3, %v2816_v61, 0.0 }
0x12f3   :  { %1889 = vadd.xlane.f32.xlu0 %v1888_v62 }
0x1321   :  { %v1767_v63 = vpop.f32.mrb[60].mxu0 }
0x1322   :  { %v3328_v1 = vadd.f32 %v1767_v63, %v3285_v4  ;;  %v2667_v2 = vpop.f32.mrb[61].mxu0 }
0x1323   :  { %v1770_v3 = vpop.f32.mrb[62].mxu0 }
0x1324   :  { %v3331_v5 = vadd.f32 %v1770_v3, %v3288_v7  ;;  %v2668_v6 = vpop.f32.mrb[63].mxu0 }
0x1329   :  { %v1870_v9 = vpop.f32.mrb[64].mxu0 }
0x132a   :  { %v2679_v10 = vpop.f32.mrb[65].mxu0  ;;  %v1879_v15 = vsel %vm243_vm3, %v1870_v9, -inf }
0x132b   :  { %1880 = vmax.xlane.f32.xlu1 %v1879_v15  ;;  %v1873_v18 = vpop.f32.mrb[66].mxu0 }
0x132c   :  { %v2680_v19 = vpop.f32.mrb[67].mxu0 }
0x133c   :  { %1900 = vrot.lane.b32.xlu1 %v3046_v11, %s2952_s25 }
0x1340   :  { %2048 = vrot.lane.b32.xlu1 %v3046_v11, %s2953_s26 }
0x1344   :  { %2098 = vrot.lane.b32.xlu1 %v3049_v14, %s2953_s26 }
0x1348   :  { %2096 = vrot.lane.b32.xlu1 %v3062_v22, %s2954_s27 }
0x1380   :  { %v1890_v4 = vpop.xlane.xlu0 %1889 }
0x1381   :  { %2817 = vrcp.f32 %v1890_v4 }
0x138b   :  { %v2818_v7 = vpop.eup %2817 }
0x138c   :  { %v1896_v13 = vmul.f32 %v2818_v7, %v2816_v61 }
0x138e   :  { %v1898_v16 = vpack.c.bf16 %v1896_v13, %v1896_v13  ;;  %v2395_v13 = vcombine.low %v3346_v17, %v3346_v17 }
0x13b8   :  { %v1881_v23 = vpop.xlane.xlu1 %1880 }
0x13b9   :  { %v1883_v8 = vsub.f32 %v1870_v9, %v1881_v23 }
0x13bb   :  { %v1886_v24 = vmul.f32 1.442695, %v1883_v8 }
0x13bc   :  { %v1901_v25 = vpop.permute.xlu1 %1900 }
0x13bd   :  { %2819 = vpow2.f32 %v1886_v24  ;;  %v1906_v12 = vsel %vm273_vm4, %v1901_v25, 0  ;;  %v2270_v24 = vrot.slane %v2395_v13, 2 }
0x13be   :  { %2682 = vmatpush3.bf16.msra.mxu1 %v1906_v12 }
0x13bf   :  { %2693 = vmatprep.subr.bf16.mxu1 %v2932_v0  ;;  %v2275_v25 = vsel %vm596_vm5, %v2270_v24, 0 }
0x13c0   :  { %v2049_v32 = vpop.permute.xlu1 %2048 }
0x13c1   :  { %2684 = vmatmul.mubr.msk.bf16.vlgmr.msra.gmra.mrb[64].mxu1 %vm243_vm3, %v1898_v16  ;;  %v2054_v34 = vsel %vm147_vm2, %v2049_v32, 0 }
0x13c2   :  { %2695 = vmatprep.mubr.msk.bf16.mxu1 %vm2933_vm0, %v2932_v0  ;;  %2694 = vmatpush3.bf16.msra.mxu1 %v2001_v21 }
0x13c3   :  { %2705 = vmatprep.subr.bf16.mxu1 %v2932_v0 }
0x13c4   :  { %v2099_v33 = vpop.permute.xlu1 %2098 }
0x13c5   :  { %v2104_v44 = vsel %vm147_vm2, %v2099_v33, 0 }
0x13c7   :  { %v2820_v22 = vpop.eup %2819 }
0x13c8   :  { %v1891_v26 = vsel %vm243_vm3, %v2820_v22, 0.0  ;;  %v2097_v49 = vpop.permute.xlu1 %2096 }
0x13c9   :  { %1892 = vadd.xlane.f32.xlu0 %v1891_v26 }
0x13df   :  { %1948 = vrot.lane.b32.xlu0 %v3049_v14, %s2952_s25 }
0x13e3   :  { %2046 = vrot.lane.b32.xlu0 %v3055_v20, %s2954_s27 }
0x1456   :  { %v1893_v27 = vpop.xlane.xlu0 %1892 }
0x1457   :  { %2821 = vrcp.f32 %v1893_v27 }
0x145a   :  { %v1949_v28 = vpop.permute.xlu0 %1948 }
0x145b   :  { %v1954_v29 = vsel %vm273_vm4, %v1949_v28, 0 }
0x145c   :  { %2688 = vmatpush3.bf16.msra.mxu0 %v1954_v29 }
0x145d   :  { %2699 = vmatprep.subr.bf16.mxu0 %v2932_v0 }
0x145e   :  { %v2047_v35 = vpop.permute.xlu0 %2046 }
0x1461   :  { %v2822_v30 = vpop.eup %2821 }
0x1462   :  { %v1897_v31 = vmul.f32 %v2822_v30, %v2820_v22 }
0x1464   :  { %v1899_v20 = vpack.c.bf16 %v1897_v31, %v1897_v31 }
0x1466   :  { %2690 = vmatmul.mubr.msk.bf16.vlgmr.msra.gmra.mrb[68].mxu0 %vm243_vm3, %v1899_v20 }
0x1467   :  { %2700 = vmatpush3.bf16.xpose.msra.mxu0 %v2054_v34  ;;  %2701 = vmatprep.mubr.msk.bf16.mxu0 %vm2933_vm0, %v2932_v0 }
0x1468   :  { %2711 = vmatprep.subr.bf16.mxu0 %v2932_v0 }
0x146e   :  { %2702 = vmatmul.mubr.msk.bf16.vlgmr.msra.gmra.mrb[72].mxu0 %vm147_vm2, %v2047_v35  ;;  %v2397_v35 = vld [vmem:[%s3412_s4] ss:$0 sm:$0xff] }
0x146f   :  { %2713 = vmatprep.mubr.msk.bf16.mxu0 %vm2933_vm0, %v2932_v0 }
0x1494   :  { %v1942_v36 = vpop.f32.mrb[64].mxu1 }
0x1495   :  { %v2685_v37 = vpop.f32.mrb[65].mxu1 }
0x1496   :  { %v1945_v38 = vpop.f32.mrb[66].mxu1 }
0x1497   :  { %v2686_v39 = vpop.f32.mrb[67].mxu1 }
0x1539   :  { %v1990_v40 = vpop.f32.mrb[68].mxu0 }
0x153a   :  { %v1996_v41 = vpack.c.bf16 %v1990_v40, %v1942_v36  ;;  %v2691_v42 = vpop.f32.mrb[69].mxu0 }
0x153b   :  { %v1993_v43 = vpop.f32.mrb[70].mxu0 }
0x153c   :  { %v2692_v45 = vpop.f32.mrb[71].mxu0  ;;  %2696 = vmatmul.mubr.msk.bf16.vlgmr.msra.gmra.mrb[68].mxu1 %vm147_vm2, %v1996_v41 }
0x153d   :  { %2706 = vmatpush3.bf16.xpose.msra.mxu1 %v2104_v44  ;;  %2707 = vmatprep.mubr.msk.bf16.mxu1 %vm2933_vm0, %v2932_v0 }
0x153e   :  { %2717 = vmatprep.subr.bf16.mxu1 %v2932_v0 }
0x1541   :  { %v2090_v46 = vpop.f32.mrb[72].mxu0 }
0x1542   :  { %v2703_v47 = vpop.f32.mrb[73].mxu0  ;;  %v2146_v48 = vsel %vm243_vm3, %v2090_v46, -inf }
0x1543   :  { %2147 = vmax.xlane.f32.xlu0 %v2146_v48  ;;  %v2093_v50 = vpop.f32.mrb[74].mxu0 }
0x1544   :  { %v2704_v51 = vpop.f32.mrb[75].mxu0  ;;  %2708 = vmatmul.mubr.msk.bf16.vlgmr.msra.gmra.mrb[72].mxu1 %vm147_vm2, %v2097_v49 }
0x1545   :  { %2719 = vmatprep.mubr.msk.bf16.mxu1 %vm2933_vm0, %v2932_v0 }
0x15d0   :  { %v2148_v52 = vpop.xlane.xlu0 %2147 }
0x15d1   :  { %v2152_v53 = vsub.f32 %v2090_v46, %v2148_v52 }
0x15d3   :  { %v2154_v54 = vmul.f32 1.442695, %v2152_v53 }
0x15d5   :  { %2823 = vpow2.f32 %v2154_v54 }
0x15df   :  { %v2824_v55 = vpop.eup %2823 }
0x15e0   :  { %v2158_v56 = vsel %vm243_vm3, %v2824_v55, 0.0 }
0x15e1   :  { %2159 = vadd.xlane.f32.xlu0 %v2158_v56 }
0x160f   :  { %v2037_v57 = vpop.f32.mrb[68].mxu1 }
0x1610   :  { %v2044_v58 = vadd.f32 %v2037_v57, %v3328_v1  ;;  %v2697_v59 = vpop.f32.mrb[69].mxu1 }
0x1611   :  { %v2040_v60 = vpop.f32.mrb[70].mxu1 }
0x1612   :  { %v2045_v61 = vadd.f32 %v2040_v60, %v3331_v5  ;;  %v2698_v62 = vpop.f32.mrb[71].mxu1 }
0x1617   :  { %v2140_v63 = vpop.f32.mrb[72].mxu1 }
0x1618   :  { %v2709_v2 = vpop.f32.mrb[73].mxu1  ;;  %v2149_v3 = vsel %vm243_vm3, %v2140_v63, -inf }
0x1619   :  { %2150 = vmax.xlane.f32.xlu1 %v2149_v3  ;;  %v2143_v6 = vpop.f32.mrb[74].mxu1 }
0x161a   :  { %v2710_v9 = vpop.f32.mrb[75].mxu1 }
0x162a   :  { %2170 = vrot.lane.b32.xlu1 %v3046_v11, %s2955_s30 }
0x166e   :  { %v2160_v10 = vpop.xlane.xlu0 %2159 }
0x166f   :  { %2825 = vrcp.f32 %v2160_v10 }
0x1679   :  { %v2826_v15 = vpop.eup %2825 }
0x167a   :  { %v2166_v19 = vmul.f32 %v2826_v15, %v2824_v55 }
0x167c   :  { %v2168_v23 = vpack.c.bf16 %v2166_v19, %v2166_v19 }
0x16a6   :  { %v2151_v18 = vpop.xlane.xlu1 %2150 }
0x16a7   :  { %v2153_v1 = vsub.f32 %v2140_v63, %v2151_v18 }
0x16a9   :  { %v2156_v4 = vmul.f32 1.442695, %v2153_v1 }
0x16aa   :  { %v2171_v7 = vpop.permute.xlu1 %2170 }
0x16ab   :  { %2827 = vpow2.f32 %v2156_v4  ;;  %v2176_v5 = vsel %vm273_vm4, %v2171_v7, 0 }
0x16ac   :  { %2712 = vmatpush3.bf16.msra.mxu0 %v2176_v5 }
0x16ad   :  { %2723 = vmatprep.subr.bf16.mxu0 %v2932_v0 }
0x16af   :  { %2714 = vmatmul.mubr.msk.bf16.vlgmr.msra.gmra.mrb[76].mxu0 %vm243_vm3, %v2168_v23 }
0x16b0   :  { %2725 = vmatprep.mubr.msk.bf16.mxu0 %vm2933_vm0, %v2932_v0  ;;  %2724 = vmatpush3.bf16.msra.mxu0 %v2275_v25 }
0x16b5   :  { %v2828_v11 = vpop.eup %2827 }
0x16b6   :  { %v2161_v8 = vsel %vm243_vm3, %v2828_v11, 0.0 }
0x16b7   :  { %2162 = vadd.xlane.f32.xlu0 %v2161_v8 }
0x16cd   :  { %2218 = vrot.lane.b32.xlu0 %v3049_v14, %s2955_s30 }
0x1744   :  { %v2163_v12 = vpop.xlane.xlu0 %2162 }
0x1745   :  { %2829 = vrcp.f32 %v2163_v12 }
0x1748   :  { %v2219_v16 = vpop.permute.xlu0 %2218 }
0x1749   :  { %v2224_v22 = vsel %vm273_vm4, %v2219_v16, 0 }
0x174a   :  { %2718 = vmatpush3.bf16.msra.mxu1 %v2224_v22 }
0x174f   :  { %v2830_v0 = vpop.eup %2829 }
0x1750   :  { %v2167_v26 = vmul.f32 %v2830_v0, %v2828_v11 }
0x1752   :  { %v2169_v21 = vpack.c.bf16 %v2167_v26, %v2167_v26 }
0x1754   :  { %2720 = vmatmul.mubr.msk.bf16.vlgmr.msra.gmra.mrb[76].mxu1 %vm243_vm3, %v2169_v21 }
0x1782   :  { %v2212_v27 = vpop.f32.mrb[76].mxu0 }
0x1783   :  { %v2715_v14 = vpop.f32.mrb[77].mxu0 }
0x1784   :  { %v2215_v28 = vpop.f32.mrb[78].mxu0 }
0x1785   :  { %v2716_v29 = vpop.f32.mrb[79].mxu0 }
0x1827   :  { %v2260_v17 = vpop.f32.mrb[76].mxu1 }
0x1828   :  { %v2266_v30 = vpack.c.bf16 %v2260_v17, %v2212_v27  ;;  %v2721_v31 = vpop.f32.mrb[77].mxu1 }
0x1829   :  { %v2263_v32 = vpop.f32.mrb[78].mxu1 }
0x182a   :  { %v2722_v20 = vpop.f32.mrb[79].mxu1  ;;  %2726 = vmatmul.mubr.msk.bf16.vlgmr.msra.gmra.mrb[80].mxu0 %vm147_vm2, %v2266_v30 }
0x18fd   :  { %v2311_v34 = vpop.f32.mrb[80].mxu0 }
0x18fe   :  { %v2318_v36 = vadd.f32 %v2311_v34, %v2044_v58  ;;  %v2727_v37 = vpop.f32.mrb[81].mxu0 }
0x18ff   :  { %v2314_v38 = vpop.f32.mrb[82].mxu0 }
0x1900   :  { %v2327_v39 = vadd.f32 %v2397_v35, %v2318_v36  ;;  %v2319_v33 = vadd.f32 %v2314_v38, %v2045_v61  ;;  %v2728_v40 = vpop.f32.mrb[83].mxu0 }
0x1902   :  { %2329 = vst.msk [vmem:[#allocation8] sm:$0xff] %vm89_vm1, %v2327_v39  ;;  %v2328_v41 = vadd.f32 %v2397_v35, %v2319_v33 }
0x1904   :  { %2330 = vst.msk [vmem:[#allocation8 + $0x8] sm:$0xff] %vm89_vm1, %v2328_v41 }
0x1905   :  { %2908 = shalt.err (!%p2905_p0)
}
0x1906   :  { %s2909_s2 = scalar_lea.hbm %s3413_s5, 256 }
0x1907   :  { %p2910_p1 = scmp.ne.s32.totalorder %s3413_s5, %s2909_s2  ;;  %p2913_p2 = scmp.lt.u32.totalorder %s2909_s2, %s3413_s5 }
0x1909   :  { %p2915_p3 = pnand %p2913_p2, %p2910_p1 }
0x190b   :  { %2918 = shalt.err (!%p2915_p3)
}
0x190c   :  { %2342 = dma.vmem_to_hbm [thread:$0]  %s2337_s3, 256, %s3413_s5, [#allocation4], %s2929_s1, %s2929_s1, %s2930_s17  }
0x190d   :  { %2923 = dma.done.wait [#allocation4], 256  }
0x190e   :  { %2924 = vsyncadd [#allocation4], 4294967040 }
0x190f   :  { %2346 = vsyncpa [#allocation3], 1 }
0x1910   :  { %2347 = vsyncpa [#allocation6], 1 }
0x1911   :  { %2348 = vsyncpa [#allocation4], 1 }

</bundles_post_ra>
